<compile_context>
chip_gen: v5e
topology: v5e:2x2
jax: 0.10.0
libtpu: 0.0.40
codegen_flags: <defaults>
</compile_context>

<pallas_src>
import functools

import numpy as np
import jax
import jax.numpy as jnp
from jax.experimental import pallas as pl
from jax.experimental.pallas import tpu as pltpu


# -----------------------------------------------------------------------------
# Fused Pallas kernel (one batch element per grid step, everything in VMEM)
# -----------------------------------------------------------------------------
def _hfblock_kernel(x_ref, t1_ref, b1_ref, t2_ref, b2_ref,
                    u_ref, bh_ref, d_ref, p_ref, r_ref, o_ref, *, res_scale):
    # x_ref : (1, H, W*C)   lane-dense activation (lane = w*C + c)
    # t*_ref: (3, W*C, W*C) block-Toeplitz W-taps of conv1/conv2, per row tap dh
    # b*_ref: (1, W*C)      biases tiled over W
    # u_ref : (6, W*C, W*C) [dh*2 + i]: pooled-conv3 W-taps folded with the
    #                        pixel-shuffle lane permutation for row parity i
    # bh_ref: (2, 1, W*C)   conv3 bias pushed through the pixel-shuffle lanes
    # d_ref : (3, H, H)     row-shift matrices (conv row taps, zero padded)
    # p_ref : (3, Hp, H)    row 2x-pool + conv3 row tap matrices
    # r_ref : (2, H, Hp)    pixel-shuffle row scatter (parity i -> rows 2hp+i)
    f32 = jnp.float32
    H, WC = x_ref.shape[1], x_ref.shape[2]
    Hp = p_ref.shape[1]

    x = x_ref[0].astype(f32)                                     # (H, W*C)

    # ---- conv1 (3x3, C->C) + bias + ReLU ------------------------------------
    acc = jnp.zeros((H, WC), f32)
    for dh in range(3):                                          # static unroll
        xs = jnp.dot(d_ref[dh], x, preferred_element_type=f32)   # row tap dh
        acc = acc + jnp.dot(xs, t1_ref[dh], preferred_element_type=f32)
    h1 = jnp.maximum(acc + b1_ref[...], 0.0)

    # ---- conv2 (3x3, C->C) + bias, * res_scale ------------------------------
    acc = jnp.zeros((H, WC), f32)
    for dh in range(3):
        hs = jnp.dot(d_ref[dh], h1, preferred_element_type=f32)
        acc = acc + jnp.dot(hs, t2_ref[dh], preferred_element_type=f32)
    res = acc + b2_ref[...]
    if res_scale != 1.0:                       # statically skipped when == 1.0
        res = res * res_scale

    # ---- AvgPool2d(2) -> conv3x3 (C->4C) -> PixelShuffle(2), all as matmuls --
    #   rp[dh] = P[dh] @ res            row half of the 2x2 pool + conv3 row tap
    #   t_i    = sum_dh rp[dh] @ U[dh,i] + bh[i]   (W-pool + conv3 W taps + the
    #            pixel-shuffle lane permutation for output-row parity i)
    #   res_h  = sum_i R[i] @ t_i       pixel-shuffle row scatter
    rp = [jnp.dot(p_ref[dh], res, preferred_element_type=f32) for dh in range(3)]
    res_h = jnp.zeros((H, WC), f32)
    for i in range(2):
        t = jnp.zeros((Hp, WC), f32)
        for dh in range(3):
            t = t + jnp.dot(rp[dh], u_ref[2 * dh + i], preferred_element_type=f32)
        res_h = res_h + jnp.dot(r_ref[i], t + bh_ref[i], preferred_element_type=f32)

    o_ref[0] = (x + res - res_h).astype(o_ref.dtype)


# -----------------------------------------------------------------------------
# Constant / weight-derived matrix builders (wrapper side, tiny)
# -----------------------------------------------------------------------------
def _build_structural_mats(H, W, C):
    """Constant 0/1 matrices for row shifts, 2x2 row pooling and PixelShuffle."""
    Hp, Wp, C4 = H // 2, W // 2, 4 * C
    # D[dh] @ X : output row h reads X row h + dh - 1 (zero outside).
    D = np.zeros((3, H, H), np.float32)
    for dh in range(3):
        for h in range(H):
            hin = h + dh - 1
            if 0 <= hin < H:
                D[dh, h, hin] = 1.0
    # P[dh] @ res : sums res rows 2*(hp+dh-1) and 2*(hp+dh-1)+1 (zero outside).
    P = np.zeros((3, Hp, H), np.float32)
    for dh in range(3):
        for hp in range(Hp):
            hin = hp + dh - 1
            if 0 <= hin < Hp:
                P[dh, hp, 2 * hin] = 1.0
                P[dh, hp, 2 * hin + 1] = 1.0
    # R[i] : scatters pooled row hp to full-resolution row 2*hp + i.
    R = np.zeros((2, H, Hp), np.float32)
    for i in range(2):
        for hp in range(Hp):
            R[i, 2 * hp + i, hp] = 1.0
    # S[i] : PixelShuffle(2) lane permutation for output-row parity i:
    #   up lane  wp*4C + c*4 + i*2 + j   ->   res_h lane (2*wp + j)*C + c
    S = np.zeros((2, Wp * C4, W * C), np.float32)
    for i in range(2):
        for j in range(2):
            for wp in range(Wp):
                for c in range(C):
                    S[i, wp * C4 + c * 4 + i * 2 + j, (2 * wp + j) * C + c] = 1.0
    return D, P, R, S


def _lane_toeplitz(w, w_in, w_out, pool=False):
    """Block-Toeplitz matrix applying the W-direction taps of a 3x3 'same' conv
    in the lane-dense (H, W*Cin) layout.  w: (3, 3, Cin, Cout) HWIO weights.
    Returns (3, w_in*Cin, w_out*Cout), indexed by the row tap dh.
    pool=True folds the W half of AvgPool2d(2) (and its 0.25 factor) so the
    matrix maps un-pooled input lanes straight to pooled-conv output lanes."""
    k, _, cin, cout = w.shape
    wi = jnp.arange(w_in)[:, None]
    wo = jnp.arange(w_out)[None, :]
    src = wi // 2 if pool else wi
    dw = src - wo + 1                                  # conv tap, valid in [0,3)
    valid = (dw >= 0) & (dw < k)
    dwc = jnp.clip(dw, 0, k - 1)
    t = w[:, dwc, :, :]                                # (3, w_in, w_out, Cin, Cout)
    if pool:
        t = t * 0.25
    t = jnp.where(valid[None, :, :, None, None], t, 0.0)
    t = t.transpose(0, 1, 3, 2, 4)                     # (3, w_in, Cin, w_out, Cout)
    return t.reshape(k, w_in * cin, w_out * cout)


# -----------------------------------------------------------------------------
# Public forward (NCHW in / NCHW out)
# -----------------------------------------------------------------------------
def hfblock1_forward(x_nchw, params, res_scale=1.0):
    B, C, H, W = x_nchw.shape
    Hp, Wp = H // 2, W // 2
    WC = W * C                 # lane dim: 128 for C=8, W=16 (fully lane-dense)

    # NCHW -> lane-dense (B, H, W*C): layout plumbing outside the kernel.
    x = jnp.transpose(x_nchw, (0, 2, 3, 1)).reshape(B, H, WC)

    D, P, R, S = _build_structural_mats(H, W, C)
    D, P, R, S = map(jnp.asarray, (D, P, R, S))

    T1 = _lane_toeplitz(params["w1"], W, W)                       # (3, WC, WC)
    T2 = _lane_toeplitz(params["w2"], W, W)                       # (3, WC, WC)
    T3p = _lane_toeplitz(params["w3"], W, Wp, pool=True)          # (3, WC, Wp*4C)
    U = jnp.einsum("dab,ibc->diac", T3p, S).reshape(6, WC, WC)    # fold shuffle

    b1 = jnp.tile(params["b1"], W).reshape(1, WC)
    b2 = jnp.tile(params["b2"], W).reshape(1, WC)
    b3 = jnp.tile(params["b3"], Wp).reshape(1, Wp * 4 * C)
    bh = jnp.einsum("ab,ibc->iac", b3, S)                         # (2, 1, WC)

    kern = functools.partial(_hfblock_kernel, res_scale=float(res_scale))
    out = pl.pallas_call(
        kern,
        out_shape=jax.ShapeDtypeStruct((B, H, WC), x.dtype),
        grid_spec=pltpu.PrefetchScalarGridSpec(
            num_scalar_prefetch=0,
            grid=(B,),                                 # one image per program
            in_specs=[
                pl.BlockSpec((1, H, WC), lambda b: (b, 0, 0)),         # x
                pl.BlockSpec((3, WC, WC), lambda b: (0, 0, 0)),        # T1
                pl.BlockSpec((1, WC), lambda b: (0, 0)),               # b1
                pl.BlockSpec((3, WC, WC), lambda b: (0, 0, 0)),        # T2
                pl.BlockSpec((1, WC), lambda b: (0, 0)),               # b2
                pl.BlockSpec((6, WC, WC), lambda b: (0, 0, 0)),        # U
                pl.BlockSpec((2, 1, WC), lambda b: (0, 0, 0)),         # bh
                pl.BlockSpec((3, H, H), lambda b: (0, 0, 0)),          # D
                pl.BlockSpec((3, Hp, H), lambda b: (0, 0, 0)),         # P
                pl.BlockSpec((2, H, Hp), lambda b: (0, 0, 0)),         # R
            ],
            out_specs=pl.BlockSpec((1, H, WC), lambda b: (b, 0, 0)),
        ),
        compiler_params=pltpu.CompilerParams(
            dimension_semantics=("parallel",)),        # feeds both v7x TCs (B=2)
    )(x, T1, b1, T2, b2, U, bh, D, P, R)

    return jnp.transpose(out.reshape(B, H, W, C), (0, 3, 1, 2))


# -----------------------------------------------------------------------------
# Pure-JAX reference (independent of the Pallas path; correctness check only)
# -----------------------------------------------------------------------------
def _ref_conv(x, w, b):
    y = jax.lax.conv_general_dilated(
        x, w, window_strides=(1, 1), padding="SAME",
        dimension_numbers=("NHWC", "HWIO", "NHWC"))
    return y + b.reshape(1, 1, 1, -1)


def hfblock1_reference(x_nchw, params, res_scale=1.0):
    x = jnp.transpose(x_nchw, (0, 2, 3, 1))
    h1 = jnp.maximum(_ref_conv(x, params["w1"], params["b1"]), 0.0)
    res = _ref_conv(h1, params["w2"], params["b2"]) * res_scale
    B, H, W, C = res.shape
    res_p = res.reshape(B, H // 2, 2, W // 2, 2, C).mean(axis=(2, 4))
    up = _ref_conv(res_p, params["w3"], params["b3"])
    r = 2
    h, w = up.shape[1], up.shape[2]
    res_h = (up.reshape(B, h, w, C, r, r)
               .transpose(0, 1, 4, 2, 5, 3)
               .reshape(B, h * r, w * r, C))
    out = x + (res - res_h)
    return jnp.transpose(out, (0, 3, 1, 2))


# -----------------------------------------------------------------------------
# Main
# -----------------------------------------------------------------------------
if __name__ == "__main__":
    B, C, H, W = 2, 8, 16, 16          # n_feats = 8, kernel_size = 3
    k = 3
    res_scale = 1.0

    key = jax.random.PRNGKey(0)
    kx, k1, k2, k3, kb1, kb2, kb3 = jax.random.split(key, 7)

    fan_in = C * k * k
    params = {
        "w1": jax.random.normal(k1, (k, k, C, C), jnp.float32) / jnp.sqrt(fan_in),
        "b1": jax.random.normal(kb1, (C,), jnp.float32) * 0.01,
        "w2": jax.random.normal(k2, (k, k, C, C), jnp.float32) / jnp.sqrt(fan_in),
        "b2": jax.random.normal(kb2, (C,), jnp.float32) * 0.01,
        "w3": jax.random.normal(k3, (k, k, C, 4 * C), jnp.float32) / jnp.sqrt(fan_in),
        "b3": jax.random.normal(kb3, (4 * C,), jnp.float32) * 0.01,
    }

    x = jax.random.normal(kx, (B, C, H, W), jnp.float32)

    fwd = jax.jit(functools.partial(hfblock1_forward, res_scale=res_scale))
    out = jax.block_until_ready(fwd(x, params))

    ref = jax.block_until_ready(hfblock1_reference(x, params, res_scale))
    assert out.shape == (B, C, H, W)
    err = float(jnp.max(jnp.abs(out - ref)))
    assert err < 2e-4, f"mismatch vs. reference: max abs err = {err}"

    print("KERNEL_OK")
</pallas_src>

<mosaic_0001>
module attributes {stable_mosaic.version = 11 : i64} {
  func.func @_hfblock_kernel(%arg0: i32, %arg1: memref<1x16x128xf32, #tpu.memory_space<vmem>>, %arg2: memref<3x128x128xf32, #tpu.memory_space<vmem>>, %arg3: memref<1x128xf32, #tpu.memory_space<vmem>>, %arg4: memref<3x128x128xf32, #tpu.memory_space<vmem>>, %arg5: memref<1x128xf32, #tpu.memory_space<vmem>>, %arg6: memref<6x128x128xf32, #tpu.memory_space<vmem>>, %arg7: memref<2x1x128xf32, #tpu.memory_space<vmem>>, %arg8: memref<3x16x16xf32, #tpu.memory_space<vmem>>, %arg9: memref<3x8x16xf32, #tpu.memory_space<vmem>>, %arg10: memref<2x16x8xf32, #tpu.memory_space<vmem>>, %arg11: memref<1x16x128xf32, #tpu.memory_space<vmem>>) attributes {dimension_semantics = [#tpu.dimension_semantics<parallel>], iteration_bounds = array<i64: 2>, scalar_prefetch = 0 : i64, scratch_operands = 0 : i64, tpu.core_type = #tpu.core_type<tc>, window_params = [{transform_indices = @transform_0, window_bounds = array<i64: 1, 16, 128>}, {pipeline_mode = #tpu.pipeline_mode<synchronous>, transform_indices = @transform_1, window_bounds = array<i64: 3, 128, 128>}, {pipeline_mode = #tpu.pipeline_mode<synchronous>, transform_indices = @transform_2, window_bounds = array<i64: 1, 128>}, {pipeline_mode = #tpu.pipeline_mode<synchronous>, transform_indices = @transform_3, window_bounds = array<i64: 3, 128, 128>}, {pipeline_mode = #tpu.pipeline_mode<synchronous>, transform_indices = @transform_4, window_bounds = array<i64: 1, 128>}, {pipeline_mode = #tpu.pipeline_mode<synchronous>, transform_indices = @transform_5, window_bounds = array<i64: 6, 128, 128>}, {pipeline_mode = #tpu.pipeline_mode<synchronous>, transform_indices = @transform_6, window_bounds = array<i64: 2, 1, 128>}, {pipeline_mode = #tpu.pipeline_mode<synchronous>, transform_indices = @transform_7, window_bounds = array<i64: 3, 16, 16>}, {pipeline_mode = #tpu.pipeline_mode<synchronous>, transform_indices = @transform_8, window_bounds = array<i64: 3, 8, 16>}, {pipeline_mode = #tpu.pipeline_mode<synchronous>, transform_indices = @transform_9, window_bounds = array<i64: 2, 16, 8>}, {transform_indices = @transform_10, window_bounds = array<i64: 1, 16, 128>}]} {
    %c0 = arith.constant 0 : index
    %c0_0 = arith.constant 0 : index
    %c0_1 = arith.constant 0 : index
    %0 = vector.load %arg1[%c0, %c0_0, %c0_1] : memref<1x16x128xf32, #tpu.memory_space<vmem>>, vector<1x16x128xf32>
    %1 = vector.shape_cast %0 : vector<1x16x128xf32> to vector<16x128xf32>
    %cst = arith.constant 0.000000e+00 : f32
    %2 = vector.broadcast %cst : f32 to vector<16x128xf32>
    %c0_2 = arith.constant 0 : index
    %c0_3 = arith.constant 0 : index
    %c0_4 = arith.constant 0 : index
    %3 = vector.load %arg8[%c0_2, %c0_3, %c0_4] : memref<3x16x16xf32, #tpu.memory_space<vmem>>, vector<1x16x16xf32>
    %4 = vector.shape_cast %3 : vector<1x16x16xf32> to vector<16x16xf32>
    %cst_5 = arith.constant dense<0.000000e+00> : vector<16x128xf32>
    %5 = tpu.matmul %4, %1, %cst_5 {dimension_numbers = #tpu.dot_dimension_numbers<[1], [0], [0], [1], [0, 0, 1, 1], [], []>} : vector<16x16xf32>, vector<16x128xf32>, vector<16x128xf32> -> vector<16x128xf32>
    %c0_6 = arith.constant 0 : index
    %c0_7 = arith.constant 0 : index
    %c0_8 = arith.constant 0 : index
    %6 = vector.load %arg2[%c0_6, %c0_7, %c0_8] : memref<3x128x128xf32, #tpu.memory_space<vmem>>, vector<1x128x128xf32>
    %7 = vector.shape_cast %6 : vector<1x128x128xf32> to vector<128x128xf32>
    %cst_9 = arith.constant dense<0.000000e+00> : vector<16x128xf32>
    %8 = tpu.matmul %5, %7, %cst_9 {dimension_numbers = #tpu.dot_dimension_numbers<[1], [0], [0], [1], [0, 0, 1, 1], [], []>} : vector<16x128xf32>, vector<128x128xf32>, vector<16x128xf32> -> vector<16x128xf32>
    %9 = arith.addf %2, %8 : vector<16x128xf32>
    %c1 = arith.constant 1 : index
    %c0_10 = arith.constant 0 : index
    %c0_11 = arith.constant 0 : index
    %10 = vector.load %arg8[%c1, %c0_10, %c0_11] : memref<3x16x16xf32, #tpu.memory_space<vmem>>, vector<1x16x16xf32>
    %11 = vector.shape_cast %10 : vector<1x16x16xf32> to vector<16x16xf32>
    %cst_12 = arith.constant dense<0.000000e+00> : vector<16x128xf32>
    %12 = tpu.matmul %11, %1, %cst_12 {dimension_numbers = #tpu.dot_dimension_numbers<[1], [0], [0], [1], [0, 0, 1, 1], [], []>} : vector<16x16xf32>, vector<16x128xf32>, vector<16x128xf32> -> vector<16x128xf32>
    %c1_13 = arith.constant 1 : index
    %c0_14 = arith.constant 0 : index
    %c0_15 = arith.constant 0 : index
    %13 = vector.load %arg2[%c1_13, %c0_14, %c0_15] : memref<3x128x128xf32, #tpu.memory_space<vmem>>, vector<1x128x128xf32>
    %14 = vector.shape_cast %13 : vector<1x128x128xf32> to vector<128x128xf32>
    %cst_16 = arith.constant dense<0.000000e+00> : vector<16x128xf32>
    %15 = tpu.matmul %12, %14, %cst_16 {dimension_numbers = #tpu.dot_dimension_numbers<[1], [0], [0], [1], [0, 0, 1, 1], [], []>} : vector<16x128xf32>, vector<128x128xf32>, vector<16x128xf32> -> vector<16x128xf32>
    %16 = arith.addf %9, %15 : vector<16x128xf32>
    %c2 = arith.constant 2 : index
    %c0_17 = arith.constant 0 : index
    %c0_18 = arith.constant 0 : index
    %17 = vector.load %arg8[%c2, %c0_17, %c0_18] : memref<3x16x16xf32, #tpu.memory_space<vmem>>, vector<1x16x16xf32>
    %18 = vector.shape_cast %17 : vector<1x16x16xf32> to vector<16x16xf32>
    %cst_19 = arith.constant dense<0.000000e+00> : vector<16x128xf32>
    %19 = tpu.matmul %18, %1, %cst_19 {dimension_numbers = #tpu.dot_dimension_numbers<[1], [0], [0], [1], [0, 0, 1, 1], [], []>} : vector<16x16xf32>, vector<16x128xf32>, vector<16x128xf32> -> vector<16x128xf32>
    %c2_20 = arith.constant 2 : index
    %c0_21 = arith.constant 0 : index
    %c0_22 = arith.constant 0 : index
    %20 = vector.load %arg2[%c2_20, %c0_21, %c0_22] : memref<3x128x128xf32, #tpu.memory_space<vmem>>, vector<1x128x128xf32>
    %21 = vector.shape_cast %20 : vector<1x128x128xf32> to vector<128x128xf32>
    %cst_23 = arith.constant dense<0.000000e+00> : vector<16x128xf32>
    %22 = tpu.matmul %19, %21, %cst_23 {dimension_numbers = #tpu.dot_dimension_numbers<[1], [0], [0], [1], [0, 0, 1, 1], [], []>} : vector<16x128xf32>, vector<128x128xf32>, vector<16x128xf32> -> vector<16x128xf32>
    %23 = arith.addf %16, %22 : vector<16x128xf32>
    %c0_24 = arith.constant 0 : index
    %c0_25 = arith.constant 0 : index
    %24 = vector.load %arg3[%c0_24, %c0_25] : memref<1x128xf32, #tpu.memory_space<vmem>>, vector<1x128xf32>
    %25 = vector.broadcast %24 : vector<1x128xf32> to vector<16x128xf32>
    %26 = arith.addf %23, %25 : vector<16x128xf32>
    %cst_26 = arith.constant 0.000000e+00 : f32
    %27 = vector.broadcast %cst_26 : f32 to vector<16x128xf32>
    %28 = arith.maximumf %26, %27 : vector<16x128xf32>
    %cst_27 = arith.constant 0.000000e+00 : f32
    %29 = vector.broadcast %cst_27 : f32 to vector<16x128xf32>
    %c0_28 = arith.constant 0 : index
    %c0_29 = arith.constant 0 : index
    %c0_30 = arith.constant 0 : index
    %30 = vector.load %arg8[%c0_28, %c0_29, %c0_30] : memref<3x16x16xf32, #tpu.memory_space<vmem>>, vector<1x16x16xf32>
    %31 = vector.shape_cast %30 : vector<1x16x16xf32> to vector<16x16xf32>
    %cst_31 = arith.constant dense<0.000000e+00> : vector<16x128xf32>
    %32 = tpu.matmul %31, %28, %cst_31 {dimension_numbers = #tpu.dot_dimension_numbers<[1], [0], [0], [1], [0, 0, 1, 1], [], []>} : vector<16x16xf32>, vector<16x128xf32>, vector<16x128xf32> -> vector<16x128xf32>
    %c0_32 = arith.constant 0 : index
    %c0_33 = arith.constant 0 : index
    %c0_34 = arith.constant 0 : index
    %33 = vector.load %arg4[%c0_32, %c0_33, %c0_34] : memref<3x128x128xf32, #tpu.memory_space<vmem>>, vector<1x128x128xf32>
    %34 = vector.shape_cast %33 : vector<1x128x128xf32> to vector<128x128xf32>
    %cst_35 = arith.constant dense<0.000000e+00> : vector<16x128xf32>
    %35 = tpu.matmul %32, %34, %cst_35 {dimension_numbers = #tpu.dot_dimension_numbers<[1], [0], [0], [1], [0, 0, 1, 1], [], []>} : vector<16x128xf32>, vector<128x128xf32>, vector<16x128xf32> -> vector<16x128xf32>
    %36 = arith.addf %29, %35 : vector<16x128xf32>
    %c1_36 = arith.constant 1 : index
    %c0_37 = arith.constant 0 : index
    %c0_38 = arith.constant 0 : index
    %37 = vector.load %arg8[%c1_36, %c0_37, %c0_38] : memref<3x16x16xf32, #tpu.memory_space<vmem>>, vector<1x16x16xf32>
    %38 = vector.shape_cast %37 : vector<1x16x16xf32> to vector<16x16xf32>
    %cst_39 = arith.constant dense<0.000000e+00> : vector<16x128xf32>
    %39 = tpu.matmul %38, %28, %cst_39 {dimension_numbers = #tpu.dot_dimension_numbers<[1], [0], [0], [1], [0, 0, 1, 1], [], []>} : vector<16x16xf32>, vector<16x128xf32>, vector<16x128xf32> -> vector<16x128xf32>
    %c1_40 = arith.constant 1 : index
    %c0_41 = arith.constant 0 : index
    %c0_42 = arith.constant 0 : index
    %40 = vector.load %arg4[%c1_40, %c0_41, %c0_42] : memref<3x128x128xf32, #tpu.memory_space<vmem>>, vector<1x128x128xf32>
    %41 = vector.shape_cast %40 : vector<1x128x128xf32> to vector<128x128xf32>
    %cst_43 = arith.constant dense<0.000000e+00> : vector<16x128xf32>
    %42 = tpu.matmul %39, %41, %cst_43 {dimension_numbers = #tpu.dot_dimension_numbers<[1], [0], [0], [1], [0, 0, 1, 1], [], []>} : vector<16x128xf32>, vector<128x128xf32>, vector<16x128xf32> -> vector<16x128xf32>
    %43 = arith.addf %36, %42 : vector<16x128xf32>
    %c2_44 = arith.constant 2 : index
    %c0_45 = arith.constant 0 : index
    %c0_46 = arith.constant 0 : index
    %44 = vector.load %arg8[%c2_44, %c0_45, %c0_46] : memref<3x16x16xf32, #tpu.memory_space<vmem>>, vector<1x16x16xf32>
    %45 = vector.shape_cast %44 : vector<1x16x16xf32> to vector<16x16xf32>
    %cst_47 = arith.constant dense<0.000000e+00> : vector<16x128xf32>
    %46 = tpu.matmul %45, %28, %cst_47 {dimension_numbers = #tpu.dot_dimension_numbers<[1], [0], [0], [1], [0, 0, 1, 1], [], []>} : vector<16x16xf32>, vector<16x128xf32>, vector<16x128xf32> -> vector<16x128xf32>
    %c2_48 = arith.constant 2 : index
    %c0_49 = arith.constant 0 : index
    %c0_50 = arith.constant 0 : index
    %47 = vector.load %arg4[%c2_48, %c0_49, %c0_50] : memref<3x128x128xf32, #tpu.memory_space<vmem>>, vector<1x128x128xf32>
    %48 = vector.shape_cast %47 : vector<1x128x128xf32> to vector<128x128xf32>
    %cst_51 = arith.constant dense<0.000000e+00> : vector<16x128xf32>
    %49 = tpu.matmul %46, %48, %cst_51 {dimension_numbers = #tpu.dot_dimension_numbers<[1], [0], [0], [1], [0, 0, 1, 1], [], []>} : vector<16x128xf32>, vector<128x128xf32>, vector<16x128xf32> -> vector<16x128xf32>
    %50 = arith.addf %43, %49 : vector<16x128xf32>
    %c0_52 = arith.constant 0 : index
    %c0_53 = arith.constant 0 : index
    %51 = vector.load %arg5[%c0_52, %c0_53] : memref<1x128xf32, #tpu.memory_space<vmem>>, vector<1x128xf32>
    %52 = vector.broadcast %51 : vector<1x128xf32> to vector<16x128xf32>
    %53 = arith.addf %50, %52 : vector<16x128xf32>
    %c0_54 = arith.constant 0 : index
    %c0_55 = arith.constant 0 : index
    %c0_56 = arith.constant 0 : index
    %54 = vector.load %arg9[%c0_54, %c0_55, %c0_56] : memref<3x8x16xf32, #tpu.memory_space<vmem>>, vector<1x8x16xf32>
    %55 = vector.shape_cast %54 : vector<1x8x16xf32> to vector<8x16xf32>
    %cst_57 = arith.constant dense<0.000000e+00> : vector<8x128xf32>
    %56 = tpu.matmul %55, %53, %cst_57 {dimension_numbers = #tpu.dot_dimension_numbers<[1], [0], [0], [1], [0, 0, 1, 1], [], []>} : vector<8x16xf32>, vector<16x128xf32>, vector<8x128xf32> -> vector<8x128xf32>
    %c1_58 = arith.constant 1 : index
    %c0_59 = arith.constant 0 : index
    %c0_60 = arith.constant 0 : index
    %57 = vector.load %arg9[%c1_58, %c0_59, %c0_60] : memref<3x8x16xf32, #tpu.memory_space<vmem>>, vector<1x8x16xf32>
    %58 = vector.shape_cast %57 : vector<1x8x16xf32> to vector<8x16xf32>
    %cst_61 = arith.constant dense<0.000000e+00> : vector<8x128xf32>
    %59 = tpu.matmul %58, %53, %cst_61 {dimension_numbers = #tpu.dot_dimension_numbers<[1], [0], [0], [1], [0, 0, 1, 1], [], []>} : vector<8x16xf32>, vector<16x128xf32>, vector<8x128xf32> -> vector<8x128xf32>
    %c2_62 = arith.constant 2 : index
    %c0_63 = arith.constant 0 : index
    %c0_64 = arith.constant 0 : index
    %60 = vector.load %arg9[%c2_62, %c0_63, %c0_64] : memref<3x8x16xf32, #tpu.memory_space<vmem>>, vector<1x8x16xf32>
    %61 = vector.shape_cast %60 : vector<1x8x16xf32> to vector<8x16xf32>
    %cst_65 = arith.constant dense<0.000000e+00> : vector<8x128xf32>
    %62 = tpu.matmul %61, %53, %cst_65 {dimension_numbers = #tpu.dot_dimension_numbers<[1], [0], [0], [1], [0, 0, 1, 1], [], []>} : vector<8x16xf32>, vector<16x128xf32>, vector<8x128xf32> -> vector<8x128xf32>
    %cst_66 = arith.constant 0.000000e+00 : f32
    %63 = vector.broadcast %cst_66 : f32 to vector<16x128xf32>
    %cst_67 = arith.constant 0.000000e+00 : f32
    %64 = vector.broadcast %cst_67 : f32 to vector<8x128xf32>
    %c0_68 = arith.constant 0 : index
    %c0_69 = arith.constant 0 : index
    %c0_70 = arith.constant 0 : index
    %65 = vector.load %arg6[%c0_68, %c0_69, %c0_70] : memref<6x128x128xf32, #tpu.memory_space<vmem>>, vector<1x128x128xf32>
    %66 = vector.shape_cast %65 : vector<1x128x128xf32> to vector<128x128xf32>
    %cst_71 = arith.constant dense<0.000000e+00> : vector<8x128xf32>
    %67 = tpu.matmul %56, %66, %cst_71 {dimension_numbers = #tpu.dot_dimension_numbers<[1], [0], [0], [1], [0, 0, 1, 1], [], []>} : vector<8x128xf32>, vector<128x128xf32>, vector<8x128xf32> -> vector<8x128xf32>
    %68 = arith.addf %64, %67 : vector<8x128xf32>
    %c2_72 = arith.constant 2 : index
    %c0_73 = arith.constant 0 : index
    %c0_74 = arith.constant 0 : index
    %69 = vector.load %arg6[%c2_72, %c0_73, %c0_74] : memref<6x128x128xf32, #tpu.memory_space<vmem>>, vector<1x128x128xf32>
    %70 = vector.shape_cast %69 : vector<1x128x128xf32> to vector<128x128xf32>
    %cst_75 = arith.constant dense<0.000000e+00> : vector<8x128xf32>
    %71 = tpu.matmul %59, %70, %cst_75 {dimension_numbers = #tpu.dot_dimension_numbers<[1], [0], [0], [1], [0, 0, 1, 1], [], []>} : vector<8x128xf32>, vector<128x128xf32>, vector<8x128xf32> -> vector<8x128xf32>
    %72 = arith.addf %68, %71 : vector<8x128xf32>
    %c4 = arith.constant 4 : index
    %c0_76 = arith.constant 0 : index
    %c0_77 = arith.constant 0 : index
    %73 = vector.load %arg6[%c4, %c0_76, %c0_77] : memref<6x128x128xf32, #tpu.memory_space<vmem>>, vector<1x128x128xf32>
    %74 = vector.shape_cast %73 : vector<1x128x128xf32> to vector<128x128xf32>
    %cst_78 = arith.constant dense<0.000000e+00> : vector<8x128xf32>
    %75 = tpu.matmul %62, %74, %cst_78 {dimension_numbers = #tpu.dot_dimension_numbers<[1], [0], [0], [1], [0, 0, 1, 1], [], []>} : vector<8x128xf32>, vector<128x128xf32>, vector<8x128xf32> -> vector<8x128xf32>
    %76 = arith.addf %72, %75 : vector<8x128xf32>
    %c0_79 = arith.constant 0 : index
    %c0_80 = arith.constant 0 : index
    %c0_81 = arith.constant 0 : index
    %77 = vector.load %arg10[%c0_79, %c0_80, %c0_81] : memref<2x16x8xf32, #tpu.memory_space<vmem>>, vector<1x16x8xf32>
    %78 = vector.shape_cast %77 : vector<1x16x8xf32> to vector<16x8xf32>
    %c0_82 = arith.constant 0 : index
    %c0_83 = arith.constant 0 : index
    %c0_84 = arith.constant 0 : index
    %79 = vector.load %arg7[%c0_82, %c0_83, %c0_84] : memref<2x1x128xf32, #tpu.memory_space<vmem>>, vector<1x1x128xf32>
    %80 = vector.shape_cast %79 : vector<1x1x128xf32> to vector<1x128xf32>
    %81 = vector.broadcast %80 : vector<1x128xf32> to vector<8x128xf32>
    %82 = arith.addf %76, %81 : vector<8x128xf32>
    %cst_85 = arith.constant dense<0.000000e+00> : vector<16x128xf32>
    %83 = tpu.matmul %78, %82, %cst_85 {dimension_numbers = #tpu.dot_dimension_numbers<[1], [0], [0], [1], [0, 0, 1, 1], [], []>} : vector<16x8xf32>, vector<8x128xf32>, vector<16x128xf32> -> vector<16x128xf32>
    %84 = arith.addf %63, %83 : vector<16x128xf32>
    %cst_86 = arith.constant 0.000000e+00 : f32
    %85 = vector.broadcast %cst_86 : f32 to vector<8x128xf32>
    %c1_87 = arith.constant 1 : index
    %c0_88 = arith.constant 0 : index
    %c0_89 = arith.constant 0 : index
    %86 = vector.load %arg6[%c1_87, %c0_88, %c0_89] : memref<6x128x128xf32, #tpu.memory_space<vmem>>, vector<1x128x128xf32>
    %87 = vector.shape_cast %86 : vector<1x128x128xf32> to vector<128x128xf32>
    %cst_90 = arith.constant dense<0.000000e+00> : vector<8x128xf32>
    %88 = tpu.matmul %56, %87, %cst_90 {dimension_numbers = #tpu.dot_dimension_numbers<[1], [0], [0], [1], [0, 0, 1, 1], [], []>} : vector<8x128xf32>, vector<128x128xf32>, vector<8x128xf32> -> vector<8x128xf32>
    %89 = arith.addf %85, %88 : vector<8x128xf32>
    %c3 = arith.constant 3 : index
    %c0_91 = arith.constant 0 : index
    %c0_92 = arith.constant 0 : index
    %90 = vector.load %arg6[%c3, %c0_91, %c0_92] : memref<6x128x128xf32, #tpu.memory_space<vmem>>, vector<1x128x128xf32>
    %91 = vector.shape_cast %90 : vector<1x128x128xf32> to vector<128x128xf32>
    %cst_93 = arith.constant dense<0.000000e+00> : vector<8x128xf32>
    %92 = tpu.matmul %59, %91, %cst_93 {dimension_numbers = #tpu.dot_dimension_numbers<[1], [0], [0], [1], [0, 0, 1, 1], [], []>} : vector<8x128xf32>, vector<128x128xf32>, vector<8x128xf32> -> vector<8x128xf32>
    %93 = arith.addf %89, %92 : vector<8x128xf32>
    %c5 = arith.constant 5 : index
    %c0_94 = arith.constant 0 : index
    %c0_95 = arith.constant 0 : index
    %94 = vector.load %arg6[%c5, %c0_94, %c0_95] : memref<6x128x128xf32, #tpu.memory_space<vmem>>, vector<1x128x128xf32>
    %95 = vector.shape_cast %94 : vector<1x128x128xf32> to vector<128x128xf32>
    %cst_96 = arith.constant dense<0.000000e+00> : vector<8x128xf32>
    %96 = tpu.matmul %62, %95, %cst_96 {dimension_numbers = #tpu.dot_dimension_numbers<[1], [0], [0], [1], [0, 0, 1, 1], [], []>} : vector<8x128xf32>, vector<128x128xf32>, vector<8x128xf32> -> vector<8x128xf32>
    %97 = arith.addf %93, %96 : vector<8x128xf32>
    %c1_97 = arith.constant 1 : index
    %c0_98 = arith.constant 0 : index
    %c0_99 = arith.constant 0 : index
    %98 = vector.load %arg10[%c1_97, %c0_98, %c0_99] : memref<2x16x8xf32, #tpu.memory_space<vmem>>, vector<1x16x8xf32>
    %99 = vector.shape_cast %98 : vector<1x16x8xf32> to vector<16x8xf32>
    %c1_100 = arith.constant 1 : index
    %c0_101 = arith.constant 0 : index
    %c0_102 = arith.constant 0 : index
    %100 = vector.load %arg7[%c1_100, %c0_101, %c0_102] : memref<2x1x128xf32, #tpu.memory_space<vmem>>, vector<1x1x128xf32>
    %101 = vector.shape_cast %100 : vector<1x1x128xf32> to vector<1x128xf32>
    %102 = vector.broadcast %101 : vector<1x128xf32> to vector<8x128xf32>
    %103 = arith.addf %97, %102 : vector<8x128xf32>
    %cst_103 = arith.constant dense<0.000000e+00> : vector<16x128xf32>
    %104 = tpu.matmul %99, %103, %cst_103 {dimension_numbers = #tpu.dot_dimension_numbers<[1], [0], [0], [1], [0, 0, 1, 1], [], []>} : vector<16x8xf32>, vector<8x128xf32>, vector<16x128xf32> -> vector<16x128xf32>
    %105 = arith.addf %84, %104 : vector<16x128xf32>
    %106 = arith.addf %1, %53 : vector<16x128xf32>
    %107 = arith.subf %106, %105 : vector<16x128xf32>
    %c0_104 = arith.constant 0 : index
    %c0_105 = arith.constant 0 : index
    %c0_106 = arith.constant 0 : index
    %108 = vector.load %arg11[%c0_104, %c0_105, %c0_106] : memref<1x16x128xf32, #tpu.memory_space<vmem>>, vector<1x16x128xf32>
    %109 = vector.shape_cast %108 : vector<1x16x128xf32> to vector<16x128xf32>
    %110 = vector.shape_cast %107 : vector<16x128xf32> to vector<1x16x128xf32>
    tpu.vector_store %arg11[%c0_104, %c0_105, %c0_106], %110 {strides = array<i32>} : memref<1x16x128xf32, #tpu.memory_space<vmem>>, vector<1x16x128xf32>,
    return
  }
  func.func @transform_0(%arg0: i32) -> (i32, i32, i32) {
    %c0_i32 = arith.constant 0 : i32
    %c0_i32_0 = arith.constant 0 : i32
    %c0_i32_1 = arith.constant 0 : i32
    return %arg0, %c0_i32, %c0_i32_0 : i32, i32, i32
  }
  func.func @transform_1(%arg0: i32) -> (i32, i32, i32) {
    %c0_i32 = arith.constant 0 : i32
    %c0_i32_0 = arith.constant 0 : i32
    %c0_i32_1 = arith.constant 0 : i32
    %c0_i32_2 = arith.constant 0 : i32
    return %c0_i32, %c0_i32_0, %c0_i32_1 : i32, i32, i32
  }
  func.func @transform_2(%arg0: i32) -> (i32, i32) {
    %c0_i32 = arith.constant 0 : i32
    %c0_i32_0 = arith.constant 0 : i32
    %c0_i32_1 = arith.constant 0 : i32
    return %c0_i32, %c0_i32_0 : i32, i32
  }
  func.func @transform_3(%arg0: i32) -> (i32, i32, i32) {
    %c0_i32 = arith.constant 0 : i32
    %c0_i32_0 = arith.constant 0 : i32
    %c0_i32_1 = arith.constant 0 : i32
    %c0_i32_2 = arith.constant 0 : i32
    return %c0_i32, %c0_i32_0, %c0_i32_1 : i32, i32, i32
  }
  func.func @transform_4(%arg0: i32) -> (i32, i32) {
    %c0_i32 = arith.constant 0 : i32
    %c0_i32_0 = arith.constant 0 : i32
    %c0_i32_1 = arith.constant 0 : i32
    return %c0_i32, %c0_i32_0 : i32, i32
  }
  func.func @transform_5(%arg0: i32) -> (i32, i32, i32) {
    %c0_i32 = arith.constant 0 : i32
    %c0_i32_0 = arith.constant 0 : i32
    %c0_i32_1 = arith.constant 0 : i32
    %c0_i32_2 = arith.constant 0 : i32
    return %c0_i32, %c0_i32_0, %c0_i32_1 : i32, i32, i32
  }
  func.func @transform_6(%arg0: i32) -> (i32, i32, i32) {
    %c0_i32 = arith.constant 0 : i32
    %c0_i32_0 = arith.constant 0 : i32
    %c0_i32_1 = arith.constant 0 : i32
    %c0_i32_2 = arith.constant 0 : i32
    return %c0_i32, %c0_i32_0, %c0_i32_1 : i32, i32, i32
  }
  func.func @transform_7(%arg0: i32) -> (i32, i32, i32) {
    %c0_i32 = arith.constant 0 : i32
    %c0_i32_0 = arith.constant 0 : i32
    %c0_i32_1 = arith.constant 0 : i32
    %c0_i32_2 = arith.constant 0 : i32
    return %c0_i32, %c0_i32_0, %c0_i32_1 : i32, i32, i32
  }
  func.func @transform_8(%arg0: i32) -> (i32, i32, i32) {
    %c0_i32 = arith.constant 0 : i32
    %c0_i32_0 = arith.constant 0 : i32
    %c0_i32_1 = arith.constant 0 : i32
    %c0_i32_2 = arith.constant 0 : i32
    return %c0_i32, %c0_i32_0, %c0_i32_1 : i32, i32, i32
  }
  func.func @transform_9(%arg0: i32) -> (i32, i32, i32) {
    %c0_i32 = arith.constant 0 : i32
    %c0_i32_0 = arith.constant 0 : i32
    %c0_i32_1 = arith.constant 0 : i32
    %c0_i32_2 = arith.constant 0 : i32
    return %c0_i32, %c0_i32_0, %c0_i32_1 : i32, i32, i32
  }
  func.func @transform_10(%arg0: i32) -> (i32, i32, i32) {
    %c0_i32 = arith.constant 0 : i32
    %c0_i32_0 = arith.constant 0 : i32
    %c0_i32_1 = arith.constant 0 : i32
    return %arg0, %c0_i32, %c0_i32_0 : i32, i32, i32
  }
}

</mosaic_0001>

<bundles_post_ra>
// kernel: tile.18
= control target key start
LH: loop header
LB: loop body
LE: loop exit
PB: predicated region body
PF: predicated region fallthrough
CT: control target
= control target key end

     0   :  { %s28_s0 = inlined_call_operand.vmem [shape: f32[8], index: 0, kind: input, shape index: {}]   ;;  %s29_s1 = inlined_call_operand.vmem [shape: f32[16,8], index: 1, kind: output, shape index: {}]  }
   0x1   :  { %v4_v0 = vld [vmem:[%s28_s0] ss:$0 sm:$0xff] }
   0x2   :  { %5 = vst [vmem:[%s29_s1] sm:$0xff] %v4_v0 }
   0x3   :  { %8 = vst [vmem:[%s29_s1 + $0x8] sm:$0xff] %v4_v0 }

// kernel: tile.19
= control target key start
LH: loop header
LB: loop body
LE: loop exit
PB: predicated region body
PF: predicated region fallthrough
CT: control target
= control target key end

     0   :  { %s131_s10 = smov 120   ;;  %s132_s11 = smov 104   ;;  %vm3_vm0 = vcmask 64512   ;;  %vm9_vm1 = vcmask 1048512   ;;  %vm15_vm2 = vcmask 982912   ;;  %vm21_vm3 = vcmask 917312   ;;  %s207_s0 = inlined_call_operand.vmem [shape: f32[16,8], index: 0, kind: input, shape index: {}]   ;;  %s208_s1 = inlined_call_operand.vmem [shape: f32[1,128], index: 1, kind: output, shape index: {}]  }
   0x1   :  { %v101_v0 = vld [vmem:[%s207_s0 + $0xf] sm:$0x1]   ;;  %v103_v1 = vld [vmem:[%s207_s0 + $0xd] sm:$0x1]   ;;  %v105_v2 = vld [vmem:[%s207_s0 + $0xb] sm:$0x1]  }
   0x2   :  { %7 = vrot.lane.b32.xlu0 %v101_v0, %s131_s10  ;;  %19 = vrot.lane.b32.xlu1 %v103_v1, %s132_s11  ;;  %s133_s14 = smov 88   ;;  %v102_v3 = vld [vmem:[%s207_s0 + $0xe] sm:$0x1]   ;;  %v104_v4 = vld [vmem:[%s207_s0 + $0xc] sm:$0x1]   ;;  %s134_s19 = smov 112  }
   0x3   :  { %31 = vrot.lane.b32.xlu2 %v105_v2, %s133_s14  ;;  %s135_s20 = smov 96   ;;  %v106_v5 = vld [vmem:[%s207_s0 + $0xa] sm:$0x1]   ;;  %s136_s23 = smov 80   ;;  %v107_v6 = vld [vmem:[%s207_s0 + $0x9] sm:$0x1]  }
   0x4   :  { %v108_v7 = vld [vmem:[%s207_s0 + $0x8] sm:$0x1]   ;;  %s137_s28 = smov 72   ;;  %s138_s29 = smov 64   ;;  %v109_v8 = vld [vmem:[%s207_s0 + $0x7] sm:$0x1]  }
   0x5   :  { %s139_s3 = smov 56   ;;  %v110_v9 = vld [vmem:[%s207_s0 + $0x6] sm:$0x1]   ;;  %v111_v10 = vld [vmem:[%s207_s0 + $0x5] sm:$0x1]   ;;  %s140_s8 = smov 48  }
   0x6   :  { %s141_s9 = smov 40   ;;  %v112_v11 = vld [vmem:[%s207_s0 + $0x4] sm:$0x1]   ;;  %s142_s12 = smov 32   ;;  %v113_v12 = vld [vmem:[%s207_s0 + $0x3] sm:$0x1]  }
   0x7   :  { %v114_v13 = vld [vmem:[%s207_s0 + $0x2] sm:$0x1]   ;;  %s143_s17 = smov 24   ;;  %s144_s18 = smov 16   ;;  %v115_v14 = vld [vmem:[%s207_s0 + $0x1] sm:$0x1]  }
   0x8   :  { %s145_s21 = smov 8   ;;  %v2_v15 = vld [vmem:[%s207_s0] sm:$0x1]   ;;  %vm27_vm4 = vcmask 851712   ;;  %vm33_vm5 = vcmask 786112   ;;  %vm39_vm6 = vcmask 720512  }
   0x9   :  { %4 = vst.msk [vmem:[#allocation0] sm:$0x1] %vm3_vm0, %v2_v15   ;;  %vm45_vm7 = vcmask 654912   ;;  %vm51_vm8 = vcmask 589312   ;;  %vm57_vm9 = vcmask 523712   ;;  %vm63_vm10 = vcmask 458112  }
   0xa   :  { %13 = vrot.lane.b32.xlu0 %v102_v3, %s134_s19  ;;  %25 = vrot.lane.b32.xlu1 %v104_v4, %s135_s20  ;;  %vm69_vm11 = vcmask 392512   ;;  %vm75_vm12 = vcmask 326912   ;;  %vm81_vm13 = vcmask 261312   ;;  %vm87_vm14 = vcmask 195712  }
   0xb   :  { %37 = vrot.lane.b32.xlu2 %v106_v5, %s136_s23  ;;  %vm93_vm15 = vcmask 130112  }
  0x12   :  { %43 = vrot.lane.b32.xlu0 %v107_v6, %s137_s28  ;;  %49 = vrot.lane.b32.xlu1 %v108_v7, %s138_s29 }
  0x13   :  { %55 = vrot.lane.b32.xlu2 %v109_v8, %s139_s3 }
  0x1a   :  { %61 = vrot.lane.b32.xlu0 %v110_v9, %s140_s8  ;;  %67 = vrot.lane.b32.xlu1 %v111_v10, %s141_s9 }
  0x1b   :  { %73 = vrot.lane.b32.xlu2 %v112_v11, %s142_s12 }
  0x22   :  { %79 = vrot.lane.b32.xlu0 %v113_v12, %s143_s17  ;;  %85 = vrot.lane.b32.xlu1 %v114_v13, %s144_s18 }
  0x23   :  { %91 = vrot.lane.b32.xlu2 %v115_v14, %s145_s21 }
  0x5d   :  { %v32_v16 = vpop.permute.xlu2 %31  }
  0x65   :  { %v38_v17 = vpop.permute.xlu2 %37  }
  0x6d   :  { %v56_v18 = vpop.permute.xlu2 %55  }
  0x74   :  { %v8_v19 = vpop.permute.xlu0 %7   ;;  %v20_v20 = vpop.permute.xlu1 %19  }
  0x75   :  { %10 = vst.msk [vmem:[#allocation0] sm:$0x1] %vm9_vm1, %v8_v19   ;;  %v74_v21 = vpop.permute.xlu2 %73  }
  0x7c   :  { %v14_v22 = vpop.permute.xlu0 %13   ;;  %v26_v23 = vpop.permute.xlu1 %25  }
  0x7d   :  { %16 = vst.msk [vmem:[#allocation0] sm:$0x1] %vm15_vm2, %v14_v22   ;;  %v92_v24 = vpop.permute.xlu2 %91  }
  0x7e   :  { %22 = vst.msk [vmem:[#allocation0] sm:$0x1] %vm21_vm3, %v20_v20  }
  0x7f   :  { %28 = vst.msk [vmem:[#allocation0] sm:$0x1] %vm27_vm4, %v26_v23  }
  0x80   :  { %34 = vst.msk [vmem:[#allocation0] sm:$0x1] %vm33_vm5, %v32_v16  }
  0x81   :  { %40 = vst.msk [vmem:[#allocation0] sm:$0x1] %vm39_vm6, %v38_v17  }
  0x84   :  { %v44_v25 = vpop.permute.xlu0 %43   ;;  %v50_v26 = vpop.permute.xlu1 %49  }
  0x85   :  { %46 = vst.msk [vmem:[#allocation0] sm:$0x1] %vm45_vm7, %v44_v25  }
  0x86   :  { %52 = vst.msk [vmem:[#allocation0] sm:$0x1] %vm51_vm8, %v50_v26  }
  0x87   :  { %58 = vst.msk [vmem:[#allocation0] sm:$0x1] %vm57_vm9, %v56_v18  }
  0x8c   :  { %v62_v27 = vpop.permute.xlu0 %61   ;;  %v68_v28 = vpop.permute.xlu1 %67  }
  0x8d   :  { %64 = vst.msk [vmem:[#allocation0] sm:$0x1] %vm63_vm10, %v62_v27  }
  0x8e   :  { %70 = vst.msk [vmem:[#allocation0] sm:$0x1] %vm69_vm11, %v68_v28  }
  0x8f   :  { %76 = vst.msk [vmem:[#allocation0] sm:$0x1] %vm75_vm12, %v74_v21  }
  0x94   :  { %v80_v29 = vpop.permute.xlu0 %79   ;;  %v86_v30 = vpop.permute.xlu1 %85  }
  0x95   :  { %82 = vst.msk [vmem:[#allocation0] sm:$0x1] %vm81_vm13, %v80_v29  }
  0x96   :  { %88 = vst.msk [vmem:[#allocation0] sm:$0x1] %vm87_vm14, %v86_v30  }
  0x97   :  { %94 = vst.msk [vmem:[#allocation0] sm:$0x1] %vm93_vm15, %v92_v24  }
  0x9e   :  { %v97_v31 = vld [vmem:[#allocation0] sm:$0x1] }
  0x9f   :  { %100 = vst [vmem:[%s208_s1] sm:$0x1] %v97_v31 }

// kernel: tile.28
= control target key start
LH: loop header
LB: loop body
LE: loop exit
PB: predicated region body
PF: predicated region fallthrough
CT: control target
= control target key end

     0   :  { %s22_s0 = inlined_call_operand.vmem [shape: f32[32], index: 0, kind: input, shape index: {}]   ;;  %s23_s1 = inlined_call_operand.vmem [shape: f32[8,32], index: 1, kind: output, shape index: {}]  }
   0x1   :  { %v4_v0 = vld [vmem:[%s22_s0] ss:$0 sm:$0xff] }
   0x2   :  { %5 = vst [vmem:[%s23_s1] sm:$0xff] %v4_v0 }

// kernel: hfblock1_forward.1
= control target key start
LH: loop header
LB: loop body
LE: loop exit
PB: predicated region body
PF: predicated region fallthrough
CT: control target
= control target key end

     0   :  { %s1478_s13 = smov 0   ;;  %s2190_s0 = inlined_call_operand.vmem [shape: f32[2,16,128], index: 0, kind: input, shape index: {}]   ;;  %s2191_s1 = inlined_call_operand.vmem [shape: f32[3,128,128], index: 1, kind: input, shape index: {}]   ;;  %s2192_s2 = inlined_call_operand.vmem [shape: f32[1,128], index: 2, kind: input, shape index: {}]   ;;  %s2193_s3 = inlined_call_operand.vmem [shape: f32[3,128,128], index: 3, kind: input, shape index: {}]   ;;  %s2194_s4 = inlined_call_operand.vmem [shape: f32[1,128], index: 4, kind: input, shape index: {}]   ;;  %s2195_s5 = inlined_call_operand.vmem [shape: f32[6,128,128], index: 5, kind: input, shape index: {}]   ;;  %s2196_s6 = inlined_call_operand.vmem [shape: f32[2,1,128], index: 6, kind: input, shape index: {}]   ;;  %s2197_s7 = inlined_call_operand.vmem [shape: f32[3,16,16], index: 7, kind: input, shape index: {}]   ;;  %s2198_s8 = inlined_call_operand.vmem [shape: f32[3,8,16], index: 8, kind: input, shape index: {}]   ;;  %s2199_s9 = inlined_call_operand.vmem [shape: f32[2,16,8], index: 9, kind: input, shape index: {}]   ;;  %s2200_s10 = inlined_call_operand.vmem [shape: f32[2,16,128], index: 10, kind: output, shape index: {}]  }
   0x1 LB: > { %s1216_s14 = sadd.s32 4294967295, %s1421_s13   ;;  %p1220_p0 = scmp.ge.s32.totalorder %s1421_s13, 1  ;;  %s1421_s13 = sphi %s1478_s13, %s20_s13  }
   0x2   : > { %p312_p1 = scmp.lt.s32.totalorder %s1421_s13, 3 }
   0x4   : > { %p313_p2 = pnand %p1220_p0, %p312_p1 }
   0x5   : > { %p350_p3 = scmp.lt.s32.totalorder (!%p313_p2), %s1216_s14, 1 }
   0x6   : > { %316 = sbr.rel (%p313_p2) target bundleno = 1004 (0x3ec), region = 60 }
   0xb   : > { %s2202_s14 = smov (!%p350_p3, %s1216_s14), 1  ;;  %v409_v0 = vld [vmem:[%s2191_s1 + $0x78] sm:$0xff]  ;;  %v408_v1 = vld [vmem:[%s2191_s1 + $0x70] sm:$0xff]  ;;  %v407_v2 = vld [vmem:[%s2191_s1 + $0x68] sm:$0xff]  ;;  %vm364_vm0 = vcmask 130048   ;;  %vm1096_vm1 = vcmask 64512  }
   0xc   : > { %482 = vmatpush.msra.mxu3 %v409_v0  ;;  %s1399_s19 = sshll.u32 %s2202_s14, 4  ;;  %v1510_v5 = vld [vmem:[%s2197_s7] sm:$0xff]  ;;  %v1515_v6 = vld [vmem:[%s2197_s7 + $0x10] sm:$0xff]  ;;  %v1266_v7 = vld [vmem:[%s2191_s1 + $0x178] sm:$0xff] }
   0xd   : > { %s1500_s22 = scalar_lea.vmem %s2190_s0, %s1399_s19  ;;  %v1246_v8 = vld [vmem:[%s2191_s1 + $0xf8] sm:$0xff]  ;;  %554 = vmatpush.msra.mxu1 %v1266_v7  ;;  %v406_v9 = vld [vmem:[%s2191_s1 + $0x60] sm:$0xff]  ;;  %v1265_v10 = vld [vmem:[%s2191_s1 + $0x170] sm:$0xff]  ;;  %s359_s23 = scalar_lea.vmem %s2200_s10, %s1399_s19 }
   0xe   : > { %483 = vmatpush.msra.mxu3 %v408_v1  ;;  %v361_v3 = vld [vmem:[%s1500_s22 + $0x8] sm:$0xff]  ;;  %v360_v4 = vld [vmem:[%s1500_s22] sm:$0xff]  ;;  %v1245_v11 = vld [vmem:[%s2191_s1 + $0xf0] sm:$0xff] }
   0xf   : > { %385 = vmatpush.msra.mxu0 %v361_v3  ;;  %433 = vmatpush.msra.mxu2 %v361_v3  ;;  %v405_v12 = vld [vmem:[%s2191_s1 + $0x58] sm:$0xff]  ;;  %v1264_v13 = vld [vmem:[%s2191_s1 + $0x168] sm:$0xff]  ;;  %v404_v15 = vld [vmem:[%s2191_s1 + $0x50] sm:$0xff] }
  0x10   : > { %484 = vmatpush.msra.mxu3 %v407_v2  ;;  %v1244_v14 = vld [vmem:[%s2191_s1 + $0xe8] sm:$0xff]  ;;  %555 = vmatpush.msra.mxu1 %v1265_v10  ;;  %v1243_v16 = vld [vmem:[%s2191_s1 + $0xe0] sm:$0xff]  ;;  %v1562_v19 = vld [vmem:[%s2197_s7 + $0x18] sm:$0xff] }
  0x11   : > { %386 = vmatpush.msra.mxu0 %v360_v4  ;;  %434 = vmatpush.msra.mxu2 %v360_v4  ;;  %v1263_v17 = vld [vmem:[%s2191_s1 + $0x160] sm:$0xff]  ;;  %v1557_v18 = vld [vmem:[%s2197_s7 + $0x8] sm:$0xff]  ;;  %v1242_v21 = vld [vmem:[%s2191_s1 + $0xd8] sm:$0xff] }
  0x12   : > { %1225 = vmatmul.msk.f32.vlgmr.msra.gmra.mxu0 %vm364_vm0, %v1510_v5  ;;  %1229 = vmatmul.msk.f32.vlgmr.msra.gmra.mxu2 %vm364_vm0, %v1515_v6  ;;  %v403_v20 = vld [vmem:[%s2191_s1 + $0x48] sm:$0xff]  ;;  %v1262_v22 = vld [vmem:[%s2191_s1 + $0x158] sm:$0xff]  ;;  %v402_v23 = vld [vmem:[%s2191_s1 + $0x40] sm:$0xff] }
  0x13   : > { %528 = vmatpush.msrb.mxu0 %v361_v3  ;;  %459 = vmatpush.msrb.mxu2 %v1246_v8  ;;  %v1241_v24 = vld [vmem:[%s2191_s1 + $0xd0] sm:$0xff]  ;;  %v401_v26 = vld [vmem:[%s2191_s1 + $0x38] sm:$0xff]  ;;  %v1240_v27 = vld [vmem:[%s2191_s1 + $0xc8] sm:$0xff] }
  0x14   : > { %485 = vmatpush.msra.mxu3 %v406_v9  ;;  %556 = vmatpush.msra.mxu1 %v1264_v13  ;;  %v1261_v25 = vld [vmem:[%s2191_s1 + $0x150] sm:$0xff]  ;;  %v1260_v28 = vld [vmem:[%s2191_s1 + $0x148] sm:$0xff]  ;;  %v1239_v30 = vld [vmem:[%s2191_s1 + $0xc0] sm:$0xff] }
  0x15   : > { %529 = vmatpush.msrb.mxu0 %v360_v4  ;;  %460 = vmatpush.msrb.mxu2 %v1245_v11  ;;  %v400_v29 = vld [vmem:[%s2191_s1 + $0x30] sm:$0xff]  ;;  %v1604_v31 = vld [vmem:[%s2197_s7 + $0x20] sm:$0xff]  ;;  %v399_v32 = vld [vmem:[%s2191_s1 + $0x28] sm:$0xff] }
  0x16   : > { %486 = vmatpush.msra.mxu3 %v405_v12  ;;  %557 = vmatpush.msra.mxu1 %v1263_v17  ;;  %v1238_v33 = vld [vmem:[%s2191_s1 + $0xb8] sm:$0xff]  ;;  %v398_v34 = vld [vmem:[%s2191_s1 + $0x20] sm:$0xff]  ;;  %v1237_v35 = vld [vmem:[%s2191_s1 + $0xb0] sm:$0xff] }
  0x17   : > { %461 = vmatpush.msrb.mxu2 %v1244_v14  ;;  %v397_v36 = vld [vmem:[%s2191_s1 + $0x18] sm:$0xff]  ;;  %v1236_v37 = vld [vmem:[%s2191_s1 + $0xa8] sm:$0xff]  ;;  %v396_v38 = vld [vmem:[%s2191_s1 + $0x10] sm:$0xff] }
  0x18   : > { %487 = vmatpush.msra.mxu3 %v404_v15  ;;  %558 = vmatpush.msra.mxu1 %v1262_v22  ;;  %v1235_v39 = vld [vmem:[%s2191_s1 + $0xa0] sm:$0xff]  ;;  %v1635_v40 = vld [vmem:[%s2197_s7 + $0x28] sm:$0xff]  ;;  %v1234_v42 = vld [vmem:[%s2191_s1 + $0x98] sm:$0xff] }
  0x19   : > { %462 = vmatpush.msrb.mxu2 %v1243_v16  ;;  %v395_v41 = vld [vmem:[%s2191_s1 + $0x8] sm:$0xff]  ;;  %v394_v43 = vld [vmem:[%s2191_s1] sm:$0xff]  ;;  %v1233_v45 = vld [vmem:[%s2191_s1 + $0x90] sm:$0xff] }
  0x1a   : > { %1226 = vmatmul.msk.f32.gmra.mxu0 %vm364_vm0, %v1557_v18  ;;  %1230 = vmatmul.msk.f32.gmra.mxu2 %vm364_vm0, %v1562_v19  ;;  %v1259_v44 = vld [vmem:[%s2191_s1 + $0x140] sm:$0xff]  ;;  %v1258_v46 = vld [vmem:[%s2191_s1 + $0x138] sm:$0xff]  ;;  %v1232_v47 = vld [vmem:[%s2191_s1 + $0x88] sm:$0xff] }
  0x1b   : > { %488 = vmatpush.msra.mxu3 %v403_v20  ;;  %463 = vmatpush.msrb.mxu2 %v1242_v21  ;;  %v1257_v48 = vld [vmem:[%s2191_s1 + $0x130] sm:$0xff]  ;;  %v1231_v49 = vld [vmem:[%s2191_s1 + $0x80] sm:$0xff]  ;;  %v1256_v50 = vld [vmem:[%s2191_s1 + $0x128] sm:$0xff] }
  0x1c   : > { %559 = vmatpush.msra.mxu1 %v1261_v25  ;;  %v1255_v51 = vld [vmem:[%s2191_s1 + $0x120] sm:$0xff]  ;;  %v1254_v52 = vld [vmem:[%s2191_s1 + $0x118] sm:$0xff]  ;;  %v1253_v53 = vld [vmem:[%s2191_s1 + $0x110] sm:$0xff] }
  0x1d   : > { %489 = vmatpush.msra.mxu3 %v402_v23  ;;  %464 = vmatpush.msrb.mxu2 %v1241_v24  ;;  %v1252_v54 = vld [vmem:[%s2191_s1 + $0x108] sm:$0xff]  ;;  %v1251_v55 = vld [vmem:[%s2191_s1 + $0x100] sm:$0xff]  ;;  %v1286_v62 = vld [vmem:[%s2193_s3 + $0xf8] sm:$0xff] }
  0x1e   : > { %560 = vmatpush.msra.mxu1 %v1260_v28  ;;  %v1285_v63 = vld [vmem:[%s2193_s3 + $0xf0] sm:$0xff]  ;;  %v1284_v2 = vld [vmem:[%s2193_s3 + $0xe8] sm:$0xff]  ;;  %v1283_v3 = vld [vmem:[%s2193_s3 + $0xe0] sm:$0xff] }
  0x1f   : > { %490 = vmatpush.msra.mxu3 %v401_v26  ;;  %465 = vmatpush.msrb.mxu2 %v1240_v27  ;;  %v1282_v7 = vld [vmem:[%s2193_s3 + $0xd8] sm:$0xff]  ;;  %v1281_v8 = vld [vmem:[%s2193_s3 + $0xd0] sm:$0xff]  ;;  %v1280_v11 = vld [vmem:[%s2193_s3 + $0xc8] sm:$0xff] }
  0x20   : > { %561 = vmatpush.msra.mxu1 %v1259_v44  ;;  %v1409_v14 = vld [vmem:[%s2192_s2] ss:$0 sm:$0xff]  ;;  %v1278_v21 = vld [vmem:[%s2193_s3 + $0xb8] sm:$0xff]  ;;  %v1277_v24 = vld [vmem:[%s2193_s3 + $0xb0] sm:$0xff] }
  0x21   : > { %491 = vmatpush.msra.mxu3 %v400_v29  ;;  %466 = vmatpush.msrb.mxu2 %v1239_v30  ;;  %v1279_v16 = vld [vmem:[%s2193_s3 + $0xc0] sm:$0xff]  ;;  %v1276_v26 = vld [vmem:[%s2193_s3 + $0xa8] sm:$0xff]  ;;  %v1304_v28 = vld [vmem:[%s2193_s3 + $0x178] sm:$0xff] }
  0x22   : > { %1249 = vmatmul.msk.f32.vlgmr.msrb.gmra.mxu0 %vm364_vm0, %v1604_v31  ;;  %562 = vmatpush.msra.mxu1 %v1258_v46  ;;  %v625_v29 = vld [vmem:[%s2193_s3 + $0x78] sm:$0xff]  ;;  %v1275_v30 = vld [vmem:[%s2193_s3 + $0xa0] sm:$0xff]  ;;  %v616_v46 = vld [vmem:[%s2193_s3 + $0x30] sm:$0xff] }
  0x23   : > { %492 = vmatpush.msra.mxu3 %v399_v32  ;;  %467 = vmatpush.msrb.mxu2 %v1238_v33  ;;  %v1303_v32 = vld [vmem:[%s2193_s3 + $0x170] sm:$0xff]  ;;  %v617_v44 = vld [vmem:[%s2193_s3 + $0x38] sm:$0xff] }
  0x24   : > { %563 = vmatpush.msra.mxu1 %v1257_v48  ;;  %v624_v33 = vld [vmem:[%s2193_s3 + $0x70] sm:$0xff]  ;;  %v615_v48 = vld [vmem:[%s2193_s3 + $0x28] sm:$0xff] }
  0x25   : > { %493 = vmatpush.msra.mxu3 %v398_v34  ;;  %468 = vmatpush.msrb.mxu2 %v1237_v35  ;;  %v1273_v34 = vld [vmem:[%s2193_s3 + $0x90] sm:$0xff]  ;;  %v622_v35 = vld [vmem:[%s2193_s3 + $0x60] sm:$0xff] }
  0x26   : > { %564 = vmatpush.msra.mxu1 %v1256_v50  ;;  %v614_v50 = vld [vmem:[%s2193_s3 + $0x20] sm:$0xff] }
  0x27   : > { %494 = vmatpush.msra.mxu3 %v397_v36  ;;  %469 = vmatpush.msrb.mxu2 %v1236_v37  ;;  %v1301_v36 = vld [vmem:[%s2193_s3 + $0x160] sm:$0xff]  ;;  %v621_v37 = vld [vmem:[%s2193_s3 + $0x58] sm:$0xff] }
  0x28   : > { %565 = vmatpush.msra.mxu1 %v1255_v51  ;;  %v1293_v51 = vld [vmem:[%s2193_s3 + $0x120] sm:$0xff] }
  0x29   : > { %495 = vmatpush.msra.mxu3 %v396_v38  ;;  %470 = vmatpush.msrb.mxu2 %v1235_v39  ;;  %v1272_v38 = vld [vmem:[%s2193_s3 + $0x88] sm:$0xff]  ;;  %v1300_v39 = vld [vmem:[%s2193_s3 + $0x158] sm:$0xff] }
  0x2a   : > { %1250 = vmatmul.msk.f32.gmra.mxu0 %vm364_vm0, %v1635_v40  ;;  %566 = vmatpush.msra.mxu1 %v1254_v52  ;;  %v1292_v52 = vld [vmem:[%s2193_s3 + $0x118] sm:$0xff] }
  0x2b   : > { %496 = vmatpush.msra.mxu3 %v395_v41  ;;  %471 = vmatpush.msrb.mxu2 %v1234_v42  ;;  %v620_v41 = vld [vmem:[%s2193_s3 + $0x50] sm:$0xff]  ;;  %v618_v42 = vld [vmem:[%s2193_s3 + $0x40] sm:$0xff] }
  0x2c   : > { %567 = vmatpush.msra.mxu1 %v1253_v53  ;;  %v1291_v53 = vld [vmem:[%s2193_s3 + $0x110] sm:$0xff] }
  0x2d   : > { %497 = vmatpush.msra.mxu3 %v394_v43  ;;  %472 = vmatpush.msrb.mxu2 %v1233_v45  ;;  %v1297_v43 = vld [vmem:[%s2193_s3 + $0x140] sm:$0xff]  ;;  %v1296_v45 = vld [vmem:[%s2193_s3 + $0x138] sm:$0xff] }
  0x2e   : > { %568 = vmatpush.msra.mxu1 %v1252_v54  ;;  %v1271_v54 = vld [vmem:[%s2193_s3 + $0x80] sm:$0xff] }
  0x2f   : > { %473 = vmatpush.msrb.mxu2 %v1232_v47  ;;  %666 = vmatpush.msrb.mxu3 %v1286_v62  ;;  %v1295_v47 = vld [vmem:[%s2193_s3 + $0x130] sm:$0xff] }
  0x30   : > { %569 = vmatpush.msra.mxu1 %v1251_v55  ;;  %v613_v55 = vld [vmem:[%s2193_s3 + $0x18] sm:$0xff] }
  0x31   : > { %474 = vmatpush.msrb.mxu2 %v1231_v49  ;;  %667 = vmatpush.msrb.mxu3 %v1285_v63  ;;  %v1294_v49 = vld [vmem:[%s2193_s3 + $0x128] sm:$0xff] }
  0x33   : > { %668 = vmatpush.msrb.mxu3 %v1284_v2 }
  0x35   : > { %669 = vmatpush.msrb.mxu3 %v1283_v3  ;;  %v1325_v3 = vld [vmem:[%s2195_s5 + $0x178] sm:$0xff] }
  0x37   : > { %670 = vmatpush.msrb.mxu3 %v1282_v7 }
  0x39   : > { %671 = vmatpush.msrb.mxu3 %v1281_v8  ;;  %v1323_v8 = vld [vmem:[%s2195_s5 + $0x168] sm:$0xff] }
  0x3b   : > { %672 = vmatpush.msrb.mxu3 %v1280_v11 }
  0x3d   : > { %673 = vmatpush.msrb.mxu3 %v1279_v16  ;;  %v1318_v16 = vld [vmem:[%s2195_s5 + $0x140] sm:$0xff] }
  0x3f   : > { %674 = vmatpush.msrb.mxu3 %v1278_v21 }
  0x41   : > { %675 = vmatpush.msrb.mxu3 %v1277_v24  ;;  %v1341_v24 = vld [vmem:[%s2195_s5 + $0x278] sm:$0xff] }
  0x43   : > { %676 = vmatpush.msrb.mxu3 %v1276_v26 }
  0x45   : > { %677 = vmatpush.msrb.mxu3 %v1275_v30 }
  0x8f   : > { %v388_v56 = vpop.f32.mrf.mxu0 }
  0x90   : > { %498 = vmatmul.f32.vlgmr.msra.gmra.mxu3 %v388_v56  ;;  %v1290_v56 = vld [vmem:[%s2193_s3 + $0x108] sm:$0xff] }
  0x95   : > { %v436_v57 = vpop.f32.mrf.mxu2 }
  0x96   : > { %475 = vmatmul.f32.vlgmr.msrb.gmra.mxu2 %v436_v57  ;;  %v612_v57 = vld [vmem:[%s2193_s3 + $0x10] sm:$0xff] }
  0x97   : > { %v391_v58 = vpop.f32.mrf.mxu0 }
  0x98   : > { %501 = vmatmul.f32.gmra.mxu3 %v391_v58  ;;  %v1289_v58 = vld [vmem:[%s2193_s3 + $0x100] sm:$0xff] }
  0x9d   : > { %v439_v59 = vpop.f32.mrf.mxu2 }
  0x9e   : > { %478 = vmatmul.f32.gmra.mxu2 %v439_v59  ;;  %v611_v59 = vld [vmem:[%s2193_s3 + $0x8] sm:$0xff] }
  0x9f   : > { %v531_v60 = vpop.f32.mrf.mxu0 }
  0xa0   : > { %570 = vmatmul.f32.vlgmr.msra.gmra.mxu1 %v531_v60  ;;  %v610_v60 = vld [vmem:[%s2193_s3] sm:$0xff] }
  0xa7   : > { %v534_v61 = vpop.f32.mrf.mxu0 }
  0xa8   : > { %573 = vmatmul.f32.gmra.mxu1 %v534_v61 }
 0x113   : > { %v499_v0 = vpop.f32.mrf.mxu3 }
 0x119   : > { %v476_v1 = vpop.f32.mrf.mxu2 }
 0x11a   : > { %v500_v10 = vadd.f32 %v499_v0, %v476_v1 }
 0x11b   : > { %v502_v12 = vpop.f32.mrf.mxu3 }
 0x11d   : > { %v571_v4 = vpop.f32.mrf.mxu1 }
 0x11e   : > { %v577_v13 = vadd.f32 %v571_v4, %v500_v10  ;;  %v1324_v4 = vld [vmem:[%s2195_s5 + $0x170] sm:$0xff]  ;;  %v1322_v10 = vld [vmem:[%s2195_s5 + $0x160] sm:$0xff] }
 0x120   : > { %v583_v22 = vadd.f32 %v1409_v14, %v577_v13  ;;  %v1320_v13 = vld [vmem:[%s2195_s5 + $0x150] sm:$0xff] }
 0x121   : > { %v479_v9 = vpop.f32.mrf.mxu2 }
 0x122   : > { %v503_v15 = vadd.f32 %v502_v12, %v479_v9  ;;  %v585_v27 = vmax.f32 %v583_v22, 0.0  ;;  %v1321_v12 = vld [vmem:[%s2195_s5 + $0x158] sm:$0xff] }
 0x123   : > { %v1317_v22 = vld [vmem:[%s2195_s5 + $0x138] sm:$0xff] }
 0x125   : > { %v574_v17 = vpop.f32.mrf.mxu1 }
 0x126   : > { %v578_v20 = vadd.f32 %v574_v17, %v503_v15 }
 0x128   : > { %v584_v23 = vadd.f32 %v1409_v14, %v578_v20  ;;  %v1319_v14 = vld [vmem:[%s2195_s5 + $0x148] sm:$0xff] }
 0x12a   : > { %v586_v25 = vmax.f32 %v584_v23, 0.0 }
 0x12c   : > { %601 = vmatpush.msra.mxu0 %v586_v25  ;;  %640 = vmatpush.msra.mxu2 %v586_v25 }
 0x12d   : > { %726 = vmatpush.msrb.mxu1 %v586_v25  ;;  %v1316_v25 = vld [vmem:[%s2195_s5 + $0x130] sm:$0xff] }
 0x12e   : > { %602 = vmatpush.msra.mxu0 %v585_v27  ;;  %641 = vmatpush.msra.mxu2 %v585_v27 }
 0x12f   : > { %727 = vmatpush.msrb.mxu1 %v585_v27  ;;  %1269 = vmatmul.msk.f32.vlgmr.msra.gmra.mxu2 %vm364_vm0, %v1515_v6  ;;  %v1274_v6 = vld [vmem:[%s2193_s3 + $0x98] sm:$0xff]  ;;  %v1410_v27 = vld [vmem:[%s2194_s4] ss:$0 sm:$0xff] }
 0x130   : > { %1287 = vmatmul.msk.f32.vlgmr.msrb.gmra.mxu1 %vm364_vm0, %v1604_v31  ;;  %1267 = vmatmul.msk.f32.vlgmr.msra.gmra.mxu0 %vm364_vm0, %v1510_v5  ;;  %v1302_v31 = vld [vmem:[%s2193_s3 + $0x168] sm:$0xff] }
 0x131   : > { %752 = vmatpush.msrb.mxu2 %v1304_v28  ;;  %689 = vmatpush.msrb.mxu0 %v625_v29  ;;  %v623_v5 = vld [vmem:[%s2193_s3 + $0x68] sm:$0xff]  ;;  %v1340_v29 = vld [vmem:[%s2195_s5 + $0x270] sm:$0xff] }
 0x132   : > { %678 = vmatpush.msrb.mxu3 %v1274_v6 }
 0x133   : > { %753 = vmatpush.msrb.mxu2 %v1303_v32  ;;  %690 = vmatpush.msrb.mxu0 %v624_v33  ;;  %v1315_v32 = vld [vmem:[%s2195_s5 + $0x128] sm:$0xff] }
 0x134   : > { %679 = vmatpush.msrb.mxu3 %v1273_v34  ;;  %v1339_v33 = vld [vmem:[%s2195_s5 + $0x268] sm:$0xff]  ;;  %v1338_v34 = vld [vmem:[%s2195_s5 + $0x260] sm:$0xff] }
 0x135   : > { %754 = vmatpush.msrb.mxu2 %v1302_v31  ;;  %691 = vmatpush.msrb.mxu0 %v623_v5  ;;  %v783_v31 = vld [vmem:[%s2198_s8] sm:$0xff]  ;;  %v1308_v5 = vld [vmem:[%s2198_s8 + $0x10] sm:$0xff] }
 0x136   : > { %680 = vmatpush.msrb.mxu3 %v1272_v38  ;;  %v1313_v38 = vld [vmem:[%s2195_s5 + $0x118] sm:$0xff] }
 0x137   : > { %1270 = vmatmul.msk.f32.gmra.mxu2 %vm364_vm0, %v1562_v19  ;;  %692 = vmatpush.msrb.mxu0 %v622_v35  ;;  %v1299_v19 = vld [vmem:[%s2193_s3 + $0x150] sm:$0xff]  ;;  %v1314_v35 = vld [vmem:[%s2195_s5 + $0x120] sm:$0xff] }
 0x138   : > { %1288 = vmatmul.msk.f32.gmra.mxu1 %vm364_vm0, %v1635_v40  ;;  %1268 = vmatmul.msk.f32.gmra.mxu0 %vm364_vm0, %v1557_v18  ;;  %v619_v40 = vld [vmem:[%s2193_s3 + $0x48] sm:$0xff] }
 0x139   : > { %755 = vmatpush.msrb.mxu2 %v1301_v36  ;;  %693 = vmatpush.msrb.mxu0 %v621_v37  ;;  %v1298_v18 = vld [vmem:[%s2193_s3 + $0x148] sm:$0xff]  ;;  %v1373_v36 = vld [vmem:[%s2195_s5 + $0x1f8] sm:$0xff] }
 0x13a   : > { %681 = vmatpush.msrb.mxu3 %v1271_v54  ;;  %v1337_v37 = vld [vmem:[%s2195_s5 + $0x258] sm:$0xff]  ;;  %v1368_v54 = vld [vmem:[%s2195_s5 + $0x1d0] sm:$0xff] }
 0x13b   : > { %756 = vmatpush.msrb.mxu2 %v1300_v39  ;;  %694 = vmatpush.msrb.mxu0 %v620_v41  ;;  %v872_v39 = vld [vmem:[%s2195_s5 + $0x78] sm:$0xff]  ;;  %v1372_v41 = vld [vmem:[%s2195_s5 + $0x1f0] sm:$0xff] }
 0x13d   : > { %757 = vmatpush.msrb.mxu2 %v1299_v19  ;;  %695 = vmatpush.msrb.mxu0 %v619_v40  ;;  %v1312_v19 = vld [vmem:[%s2195_s5 + $0x110] sm:$0xff] }
 0x13e   : > { %v1336_v40 = vld [vmem:[%s2195_s5 + $0x250] sm:$0xff] }
 0x13f   : > { %758 = vmatpush.msrb.mxu2 %v1298_v18  ;;  %696 = vmatpush.msrb.mxu0 %v618_v42  ;;  %v871_v18 = vld [vmem:[%s2195_s5 + $0x70] sm:$0xff]  ;;  %v1371_v42 = vld [vmem:[%s2195_s5 + $0x1e8] sm:$0xff] }
 0x141   : > { %759 = vmatpush.msrb.mxu2 %v1297_v43  ;;  %697 = vmatpush.msrb.mxu0 %v617_v44  ;;  %v1311_v43 = vld [vmem:[%s2195_s5 + $0x108] sm:$0xff] }
 0x142   : > { %v1335_v44 = vld [vmem:[%s2195_s5 + $0x248] sm:$0xff] }
 0x143   : > { %760 = vmatpush.msrb.mxu2 %v1296_v45  ;;  %698 = vmatpush.msrb.mxu0 %v616_v46  ;;  %v1306_v45 = vld [vmem:[%s2198_s8 + $0x8] sm:$0xff]  ;;  %v1370_v46 = vld [vmem:[%s2195_s5 + $0x1e0] sm:$0xff] }
 0x145   : > { %761 = vmatpush.msrb.mxu2 %v1295_v47  ;;  %699 = vmatpush.msrb.mxu0 %v615_v48  ;;  %v870_v47 = vld [vmem:[%s2195_s5 + $0x68] sm:$0xff]  ;;  %v1310_v48 = vld [vmem:[%s2195_s5 + $0x100] sm:$0xff] }
 0x147   : > { %762 = vmatpush.msrb.mxu2 %v1294_v49  ;;  %700 = vmatpush.msrb.mxu0 %v614_v50  ;;  %v1357_v49 = vld [vmem:[%s2195_s5 + $0xf8] sm:$0xff] }
 0x148   : > { %v1369_v50 = vld [vmem:[%s2195_s5 + $0x1d8] sm:$0xff] }
 0x149   : > { %763 = vmatpush.msrb.mxu2 %v1293_v51  ;;  %701 = vmatpush.msrb.mxu0 %v613_v55  ;;  %v869_v51 = vld [vmem:[%s2195_s5 + $0x60] sm:$0xff]  ;;  %v868_v55 = vld [vmem:[%s2195_s5 + $0x58] sm:$0xff] }
 0x14b   : > { %764 = vmatpush.msrb.mxu2 %v1292_v52  ;;  %702 = vmatpush.msrb.mxu0 %v612_v57  ;;  %v1334_v52 = vld [vmem:[%s2195_s5 + $0x240] sm:$0xff]  ;;  %v1355_v57 = vld [vmem:[%s2195_s5 + $0xe8] sm:$0xff] }
 0x14d   : > { %765 = vmatpush.msrb.mxu2 %v1291_v53  ;;  %703 = vmatpush.msrb.mxu0 %v611_v59  ;;  %v1356_v53 = vld [vmem:[%s2195_s5 + $0xf0] sm:$0xff] }
 0x14e   : > { %v867_v59 = vld [vmem:[%s2195_s5 + $0x50] sm:$0xff] }
 0x14f   : > { %766 = vmatpush.msrb.mxu2 %v1290_v56  ;;  %704 = vmatpush.msrb.mxu0 %v610_v60  ;;  %v1333_v56 = vld [vmem:[%s2195_s5 + $0x238] sm:$0xff]  ;;  %v1332_v60 = vld [vmem:[%s2195_s5 + $0x230] sm:$0xff] }
 0x151   : > { %767 = vmatpush.msrb.mxu2 %v1289_v58  ;;  %890 = vmatpush.msra.mxu0 %v1325_v3  ;;  %v1367_v58 = vld [vmem:[%s2195_s5 + $0x1c8] sm:$0xff]  ;;  %v865_v3 = vld [vmem:[%s2195_s5 + $0x40] sm:$0xff] }
 0x153   : > { %891 = vmatpush.msra.mxu0 %v1324_v4  ;;  %947 = vmatpush.msra.mxu2 %v1341_v24  ;;  %v1330_v4 = vld [vmem:[%s2195_s5 + $0x220] sm:$0xff]  ;;  %v1385_v24 = vld [vmem:[%s2195_s5 + $0x2d8] sm:$0xff] }
 0x155   : > { %892 = vmatpush.msra.mxu0 %v1323_v8  ;;  %948 = vmatpush.msra.mxu2 %v1340_v29  ;;  %v1364_v8 = vld [vmem:[%s2195_s5 + $0x1b0] sm:$0xff]  ;;  %v1381_v29 = vld [vmem:[%s2195_s5 + $0x2b8] sm:$0xff] }
 0x157   : > { %893 = vmatpush.msra.mxu0 %v1322_v10  ;;  %949 = vmatpush.msra.mxu2 %v1339_v33  ;;  %v1351_v10 = vld [vmem:[%s2195_s5 + $0xc8] sm:$0xff]  ;;  %v1350_v33 = vld [vmem:[%s2195_s5 + $0xc0] sm:$0xff] }
 0x159   : > { %894 = vmatpush.msra.mxu0 %v1321_v12  ;;  %950 = vmatpush.msra.mxu2 %v1338_v34  ;;  %v862_v12 = vld [vmem:[%s2195_s5 + $0x28] sm:$0xff]  ;;  %v1349_v34 = vld [vmem:[%s2195_s5 + $0xb8] sm:$0xff] }
 0x15b   : > { %895 = vmatpush.msra.mxu0 %v1320_v13  ;;  %951 = vmatpush.msra.mxu2 %v1337_v37  ;;  %v861_v13 = vld [vmem:[%s2195_s5 + $0x20] sm:$0xff]  ;;  %v1348_v37 = vld [vmem:[%s2195_s5 + $0xb0] sm:$0xff] }
 0x15d   : > { %896 = vmatpush.msra.mxu0 %v1319_v14  ;;  %952 = vmatpush.msra.mxu2 %v1336_v40  ;;  %v860_v14 = vld [vmem:[%s2195_s5 + $0x18] sm:$0xff]  ;;  %v1326_v40 = vld [vmem:[%s2195_s5 + $0x200] sm:$0xff] }
 0x15f   : > { %897 = vmatpush.msra.mxu0 %v1318_v16  ;;  %953 = vmatpush.msra.mxu2 %v1335_v44  ;;  %v858_v16 = vld [vmem:[%s2195_s5 + $0x8] sm:$0xff]  ;;  %v1346_v44 = vld [vmem:[%s2195_s5 + $0xa0] sm:$0xff] }
 0x161   : > { %898 = vmatpush.msra.mxu0 %v1317_v22  ;;  %954 = vmatpush.msra.mxu2 %v1334_v52  ;;  %v1387_v22 = vld [vmem:[%s2195_s5 + $0x2e8] sm:$0xff]  ;;  %v1342_v52 = vld [vmem:[%s2195_s5 + $0x80] sm:$0xff] }
 0x163   : > { %899 = vmatpush.msra.mxu0 %v1316_v25  ;;  %955 = vmatpush.msra.mxu2 %v1333_v56  ;;  %v1384_v25 = vld [vmem:[%s2195_s5 + $0x2d0] sm:$0xff] }
 0x165   : > { %900 = vmatpush.msra.mxu0 %v1315_v32  ;;  %956 = vmatpush.msra.mxu2 %v1332_v60  ;;  %v1329_v32 = vld [vmem:[%s2195_s5 + $0x218] sm:$0xff] }
 0x167   : > { %901 = vmatpush.msra.mxu0 %v1314_v35  ;;  %v1327_v35 = vld [vmem:[%s2195_s5 + $0x208] sm:$0xff] }
 0x169   : > { %902 = vmatpush.msra.mxu0 %v1313_v38  ;;  %v1380_v38 = vld [vmem:[%s2195_s5 + $0x2b0] sm:$0xff] }
 0x16b   : > { %903 = vmatpush.msra.mxu0 %v1312_v19  ;;  %v1378_v19 = vld [vmem:[%s2195_s5 + $0x2a0] sm:$0xff] }
 0x16d   : > { %904 = vmatpush.msra.mxu0 %v1311_v43  ;;  %v1377_v43 = vld [vmem:[%s2195_s5 + $0x298] sm:$0xff] }
 0x16f   : > { %905 = vmatpush.msra.mxu0 %v1310_v48  ;;  %v1344_v48 = vld [vmem:[%s2195_s5 + $0x90] sm:$0xff] }
 0x1ad   : > { %v729_v61 = vpop.f32.mrf.mxu1  ;;  %v604_v62 = vpop.f32.mrf.mxu0 }
 0x1ae   : > { %768 = vmatmul.f32.vlgmr.msrb.gmra.mxu2 %v729_v61  ;;  %705 = vmatmul.f32.vlgmr.msrb.gmra.mxu0 %v604_v62  ;;  %v1354_v61 = vld [vmem:[%s2195_s5 + $0xe0] sm:$0xff] }
 0x1af   : > { %1029 = vmatpush.msrb.mxu0 %v1357_v49  ;;  %v1366_v62 = vld [vmem:[%s2195_s5 + $0x1c0] sm:$0xff]  ;;  %v1375_v49 = vld [vmem:[%s2195_s5 + $0x288] sm:$0xff] }
 0x1b1   : > { %1030 = vmatpush.msrb.mxu0 %v1356_v53 }
 0x1b2   : > { %v643_v63 = vpop.f32.mrf.mxu2 }
 0x1b3   : > { %682 = vmatmul.f32.vlgmr.msrb.gmra.mxu3 %v643_v63  ;;  %v866_v63 = vld [vmem:[%s2195_s5 + $0x48] sm:$0xff]  ;;  %1031 = vmatpush.msrb.mxu0 %v1355_v57 }
 0x1b5   : > { %v732_v0 = vpop.f32.mrf.mxu1  ;;  %v607_v1 = vpop.f32.mrf.mxu0  ;;  %1032 = vmatpush.msrb.mxu0 %v1354_v61 }
 0x1b6   : > { %771 = vmatmul.f32.gmra.mxu2 %v732_v0  ;;  %708 = vmatmul.f32.gmra.mxu0 %v607_v1  ;;  %v1331_v0 = vld [vmem:[%s2195_s5 + $0x228] sm:$0xff]  ;;  %v1353_v1 = vld [vmem:[%s2195_s5 + $0xd8] sm:$0xff] }
 0x1b7   : > { %957 = vmatpush.msra.mxu2 %v1331_v0  ;;  %1033 = vmatpush.msrb.mxu0 %v1353_v1 }
 0x1b9   : > { %958 = vmatpush.msra.mxu2 %v1330_v4 }
 0x1ba   : > { %v646_v2 = vpop.f32.mrf.mxu2 }
 0x1bb   : > { %685 = vmatmul.f32.gmra.mxu3 %v646_v2  ;;  %v1365_v2 = vld [vmem:[%s2195_s5 + $0x1b8] sm:$0xff]  ;;  %959 = vmatpush.msra.mxu2 %v1329_v32 }
 0x22b   : > { %v706_v7 = vpop.f32.mrf.mxu0 }
 0x231   : > { %v769_v9 = vpop.f32.mrf.mxu2 }
 0x233   : > { %v709_v15 = vpop.f32.mrf.mxu0 }
 0x236   : > { %v683_v11 = vpop.f32.mrf.mxu3 }
 0x237   : > { %v707_v17 = vadd.f32 %v706_v7, %v683_v11  ;;  %v1352_v7 = vld [vmem:[%s2195_s5 + $0xd0] sm:$0xff] }
 0x238   : > { %v863_v11 = vld [vmem:[%s2195_s5 + $0x30] sm:$0xff]  ;;  %1034 = vmatpush.msrb.mxu0 %v1352_v7 }
 0x239   : > { %v772_v21 = vpop.f32.mrf.mxu2  ;;  %v775_v26 = vadd.f32 %v769_v9, %v707_v17  ;;  %v864_v9 = vld [vmem:[%s2195_s5 + $0x38] sm:$0xff]  ;;  %v857_v17 = vld [vmem:[%s2195_s5] sm:$0xff] }
 0x23a   : > { %1035 = vmatpush.msrb.mxu0 %v1351_v10  ;;  %v969_v10 = vld [vmem:[%s2199_s9 + $0x8] sm:$0xff] }
 0x23b   : > { %v1890_v6 = vadd.f32 %v1410_v27, %v775_v26  ;;  %v1383_v26 = vld [vmem:[%s2195_s5 + $0x2c8] sm:$0xff] }
 0x23c   : > { %1036 = vmatpush.msrb.mxu0 %v1350_v33 }
 0x23e   : > { %v686_v20 = vpop.f32.mrf.mxu3  ;;  %1037 = vmatpush.msrb.mxu0 %v1349_v34 }
 0x23f   : > { %v710_v23 = vadd.f32 %v709_v15, %v686_v20  ;;  %v859_v15 = vld [vmem:[%s2195_s5 + $0x10] sm:$0xff]  ;;  %v1389_v20 = vld [vmem:[%s2195_s5 + $0x2f8] sm:$0xff] }
 0x240   : > { %1038 = vmatpush.msrb.mxu0 %v1348_v37 }
 0x241   : > { %v776_v28 = vadd.f32 %v772_v21, %v710_v23  ;;  %v1388_v21 = vld [vmem:[%s2195_s5 + $0x2f0] sm:$0xff]  ;;  %v1386_v23 = vld [vmem:[%s2195_s5 + $0x2e0] sm:$0xff] }
 0x243   : > { %v1882_v30 = vadd.f32 %v1410_v27, %v776_v28  ;;  %v1382_v27 = vld [vmem:[%s2195_s5 + $0x2c0] sm:$0xff]  ;;  %v1363_v28 = vld [vmem:[%s2195_s5 + $0x1a8] sm:$0xff] }
 0x245   : > { %801 = vmatpush.msra.mxu1 %v1882_v30  ;;  %851 = vmatpush.msra.mxu3 %v1882_v30 }
 0x247   : > { %802 = vmatpush.msra.mxu1 %v1890_v6  ;;  %852 = vmatpush.msra.mxu3 %v1890_v6 }
 0x248   : > { %1305 = vmatmul.msk.f32.vlgmr.msra.gmra.mxu1 %vm364_vm0, %v783_v31  ;;  %1309 = vmatmul.msk.f32.vlgmr.msra.gmra.mxu3 %vm364_vm0, %v1308_v5  ;;  %v1328_v31 = vld [vmem:[%s2195_s5 + $0x210] sm:$0xff]  ;;  %v1362_v5 = vld [vmem:[%s2195_s5 + $0x1a0] sm:$0xff] }
 0x249   : > { %826 = vmatpush.msrb.mxu1 %v1882_v30  ;;  %1009 = vmatpush.msrb.mxu3 %v1373_v36  ;;  %v1361_v36 = vld [vmem:[%s2195_s5 + $0x198] sm:$0xff] }
 0x24a   : > { %960 = vmatpush.msra.mxu2 %v1328_v31 }
 0x24b   : > { %827 = vmatpush.msrb.mxu1 %v1890_v6  ;;  %1010 = vmatpush.msrb.mxu3 %v1372_v41  ;;  %v1360_v41 = vld [vmem:[%s2195_s5 + $0x190] sm:$0xff] }
 0x24c   : > { %961 = vmatpush.msra.mxu2 %v1327_v35 }
 0x24d   : > { %910 = vmatpush.msra.mxu1 %v872_v39  ;;  %1011 = vmatpush.msrb.mxu3 %v1371_v42  ;;  %v1379_v39 = vld [vmem:[%s2195_s5 + $0x2a8] sm:$0xff] }
 0x24e   : > { %v1359_v42 = vld [vmem:[%s2195_s5 + $0x188] sm:$0xff]  ;;  %962 = vmatpush.msra.mxu2 %v1326_v40 }
 0x24f   : > { %911 = vmatpush.msra.mxu1 %v871_v18  ;;  %1012 = vmatpush.msrb.mxu3 %v1370_v46  ;;  %v1347_v18 = vld [vmem:[%s2195_s5 + $0xa8] sm:$0xff]  ;;  %v1345_v46 = vld [vmem:[%s2195_s5 + $0x98] sm:$0xff] }
 0x250   : > { %1307 = vmatmul.msk.f32.vlgmr.msrb.gmra.mxu1 %vm364_vm0, %v1306_v45  ;;  %1039 = vmatpush.msrb.mxu0 %v1347_v18  ;;  %v1358_v45 = vld [vmem:[%s2195_s5 + $0x180] sm:$0xff] }
 0x251   : > { %912 = vmatpush.msra.mxu1 %v870_v47  ;;  %1013 = vmatpush.msrb.mxu3 %v1369_v50  ;;  %v1376_v47 = vld [vmem:[%s2195_s5 + $0x290] sm:$0xff]  ;;  %v1343_v50 = vld [vmem:[%s2195_s5 + $0x88] sm:$0xff] }
 0x252   : > { %1040 = vmatpush.msrb.mxu0 %v1346_v44 }
 0x253   : > { %913 = vmatpush.msra.mxu1 %v869_v51  ;;  %1014 = vmatpush.msrb.mxu3 %v1368_v54  ;;  %v1374_v51 = vld [vmem:[%s2195_s5 + $0x280] sm:$0xff] }
 0x254   : > { %1041 = vmatpush.msrb.mxu0 %v1345_v46 }
 0x255   : > { %914 = vmatpush.msra.mxu1 %v868_v55  ;;  %1015 = vmatpush.msrb.mxu3 %v1367_v58 }
 0x256   : > { %1042 = vmatpush.msrb.mxu0 %v1344_v48 }
 0x257   : > { %915 = vmatpush.msra.mxu1 %v867_v59  ;;  %1016 = vmatpush.msrb.mxu3 %v1366_v62  ;;  %v1411_v59 = vld [vmem:[%s2196_s6] ss:$0 sm:$0xff] }
 0x258   : > { %1043 = vmatpush.msrb.mxu0 %v1343_v50 }
 0x259   : > { %916 = vmatpush.msra.mxu1 %v866_v63  ;;  %1017 = vmatpush.msrb.mxu3 %v1365_v2  ;;  %v968_v63 = vld [vmem:[%s2199_s9] sm:$0xff] }
 0x25a   : > { %1044 = vmatpush.msrb.mxu0 %v1342_v52 }
 0x25b   : > { %917 = vmatpush.msra.mxu1 %v865_v3  ;;  %1018 = vmatpush.msrb.mxu3 %v1364_v8  ;;  %v1412_v3 = vld [vmem:[%s2196_s6 + $0x1] ss:$0 sm:$0xff] }
 0x25d   : > { %918 = vmatpush.msra.mxu1 %v864_v9  ;;  %1019 = vmatpush.msrb.mxu3 %v1363_v28  ;;  %v1390_v9 = vld [vmem:[%s2199_s9 + $0x10] sm:$0xff] }
 0x25f   : > { %919 = vmatpush.msra.mxu1 %v863_v11  ;;  %1020 = vmatpush.msrb.mxu3 %v1362_v5  ;;  %v1391_v11 = vld [vmem:[%s2199_s9 + $0x18] sm:$0xff] }
 0x261   : > { %920 = vmatpush.msra.mxu1 %v862_v12  ;;  %1021 = vmatpush.msrb.mxu3 %v1361_v36 }
 0x263   : > { %921 = vmatpush.msra.mxu1 %v861_v13  ;;  %1022 = vmatpush.msrb.mxu3 %v1360_v41 }
 0x265   : > { %922 = vmatpush.msra.mxu1 %v860_v14  ;;  %1023 = vmatpush.msrb.mxu3 %v1359_v42 }
 0x267   : > { %923 = vmatpush.msra.mxu1 %v859_v15  ;;  %1024 = vmatpush.msrb.mxu3 %v1358_v45  ;;  %v1413_v15 = vld [vmem:[%s1500_s22] sm:$0xff] }
 0x269   : > { %924 = vmatpush.msra.mxu1 %v858_v16  ;;  %v1155_v16 = vadd.f32 %v1413_v15, %v1890_v6 }
 0x26b   : > { %925 = vmatpush.msra.mxu1 %v857_v17 }
 0x26d   : > { %1066 = vmatpush.msrb.mxu1 %v1389_v20 }
 0x26f   : > { %1067 = vmatpush.msrb.mxu1 %v1388_v21 }
 0x271   : > { %1068 = vmatpush.msrb.mxu1 %v1387_v22 }
 0x273   : > { %1069 = vmatpush.msrb.mxu1 %v1386_v23  ;;  %v1414_v23 = vld [vmem:[%s1500_s22 + $0x8] sm:$0xff] }
 0x275   : > { %1070 = vmatpush.msrb.mxu1 %v1385_v24  ;;  %v1156_v24 = vadd.f32 %v1414_v23, %v1882_v30 }
 0x277   : > { %1071 = vmatpush.msrb.mxu1 %v1384_v25 }
 0x279   : > { %1072 = vmatpush.msrb.mxu1 %v1383_v26 }
 0x27b   : > { %1073 = vmatpush.msrb.mxu1 %v1382_v27 }
 0x27d   : > { %1074 = vmatpush.msrb.mxu1 %v1381_v29 }
 0x27f   : > { %1075 = vmatpush.msrb.mxu1 %v1380_v38 }
 0x281   : > { %1076 = vmatpush.msrb.mxu1 %v1379_v39 }
 0x283   : > { %1077 = vmatpush.msrb.mxu1 %v1378_v19 }
 0x285   : > { %1078 = vmatpush.msrb.mxu1 %v1377_v43 }
 0x287   : > { %1079 = vmatpush.msrb.mxu1 %v1376_v47 }
 0x289   : > { %1080 = vmatpush.msrb.mxu1 %v1375_v49 }
 0x28b   : > { %1081 = vmatpush.msrb.mxu1 %v1374_v51 }
 0x2c5   : > { %v804_v53 = vpop.f32.mrf.mxu1 }
 0x2c6   : > { %926 = vmatmul.f32.vlgmr.msra.gmra.mxu1 %v804_v53 }
 0x2cb   : > { %v854_v54 = vpop.f32.mrf.mxu3 }
 0x2cc   : > { %963 = vmatmul.f32.vlgmr.msra.gmra.mxu2 %v854_v54 }
 0x2cd   : > { %v829_v55 = vpop.f32.mrf.mxu1 }
 0x2ce   : > { %906 = vmatmul.f32.vlgmr.msra.gmra.mxu0 %v829_v55  ;;  %1025 = vmatmul.f32.vlgmr.msrb.gmra.mxu3 %v829_v55 }
 0x2cf   : > { %1082 = vmatmul.f32.vlgmr.msrb.gmra.mxu1 %v854_v54 }
 0x2d6   : > { %1045 = vmatmul.f32.vlgmr.msrb.gmra.mxu0 %v804_v53 }
 0x343   : > { %v927_v57 = vpop.f32.mrf.mxu1 }
 0x34b   : > { %v907_v56 = vpop.f32.mrf.mxu0 }
 0x34c   : > { %v928_v58 = vadd.f32 %v927_v57, %v907_v56  ;;  %v1083_v4 = vpop.f32.mrf.mxu1 }
 0x34f   : > { %v964_v60 = vpop.f32.mrf.mxu2 }
 0x350   : > { %v967_v61 = vadd.f32 %v964_v60, %v928_v58 }
 0x351   : > { %v1026_v0 = vpop.f32.mrf.mxu3 }
 0x352   : > { %v974_v62 = vadd.f32 %v1411_v59, %v967_v61 }
 0x353   : > { %v1046_v1 = vpop.f32.mrf.mxu0 }
 0x354   : > { %v1047_v2 = vadd.f32 %v1046_v1, %v1026_v0  ;;  %1147 = vmatpush.msra.mxu3 %v974_v62 }
 0x355   : > { %1395 = vmatmul.msk.f32.vlgmr.msra.gmra.mxu3 %vm1096_vm1, %v968_v63 }
 0x356   : > { %v1086_v7 = vadd.f32 %v1083_v4, %v1047_v2 }
 0x358   : > { %v1095_v8 = vadd.f32 %v1412_v3, %v1086_v7 }
 0x35a   : > { %1118 = vmatpush.msrb.mxu2 %v1095_v8 }
 0x35b   : > { %1393 = vmatmul.msk.f32.vlgmr.msrb.gmra.mxu2 %vm1096_vm1, %v1390_v9 }
 0x35d   : > { %1396 = vmatmul.msk.f32.gmra.mxu3 %vm1096_vm1, %v969_v10 }
 0x363   : > { %1394 = vmatmul.msk.f32.gmra.mxu2 %vm1096_vm1, %v1391_v11 }
 0x3d8   : > { %v1149_v12 = vpop.f32.mrf.mxu3 }
 0x3de   : > { %v1120_v13 = vpop.f32.mrf.mxu2 }
 0x3df   : > { %v1150_v14 = vadd.f32 %v1149_v12, %v1120_v13 }
 0x3e0   : > { %v1152_v20 = vpop.f32.mrf.mxu3 }
 0x3e1   : > { %v1157_v17 = vsub.f32 %v1155_v16, %v1150_v14 }
 0x3e3   : > { %1159 = vst [vmem:[%s359_s23] sm:$0xff] %v1157_v17 }
 0x3e6   : > { %v1123_v21 = vpop.f32.mrf.mxu2 }
 0x3e7   : > { %v1153_v22 = vadd.f32 %v1152_v20, %v1123_v21 }
 0x3e9   : > { %v1158_v25 = vsub.f32 %v1156_v24, %v1153_v22 }
 0x3eb   : > { %1160 = vst [vmem:[%s359_s23 + $0x8] sm:$0xff] %v1158_v25 }
 0x3ec PF: > { %s20_s13 = sadd.s32 1, %s1421_s13  }
 0x3ed   : > { %p17_p4 = scmp.ge.s32.totalorder %s20_s13, 4  }
 0x3ef   :  { %19 = sbr.rel (!%p17_p4) target bundleno = 1 (0x1), region = 105 }

</bundles_post_ra>
